<compile_context>
chip_gen: v6e
topology: v6e:2x2x1
jax: 0.10.0
libtpu: 0.0.40
codegen_flags: <defaults>
</compile_context>

<pallas_src>
import functools
import math

import jax
import jax.numpy as jnp
import numpy as np
from jax.experimental import pallas as pl
from jax.experimental.pallas import tpu as pltpu


def _round_up(x, m):
    return (x + m - 1) // m * m


def ine_kernel(a_ref, xw_ref, d_ref, expo_ref,
               bg_ref, weh_ref, wee_ref, be_ref,
               emb_ref, acc_ref):
    """One (row-tile, k-tile) step of relu(d * (A_hat @ xw_scaled) + b) + embedding."""
    k = pl.program_id(1)

    @pl.when(k == 0)
    def _():
        acc_ref[...] = jnp.zeros_like(acc_ref)

    # Dominant MXU op: partial contraction against the self-loop-folded adjacency.
    a = a_ref[...]
    if a.dtype != xw_ref.dtype:     # e.g. fp8 A with bf16 xw (v7x traffic option)
        a = a.astype(xw_ref.dtype)
    acc_ref[...] += jnp.dot(a, xw_ref[...], preferred_element_type=jnp.float32)

    @pl.when(k == pl.num_programs(1) - 1)
    def _():
        # GCN activation; norm folded:  A_norm @ xw == d_row * (A_hat @ (d_col * xw))
        h = jnp.maximum(d_ref[...] * acc_ref[...] + bg_ref[...], 0.0)
        # Embedding with the exposure column folded out of the concat.
        emb = jnp.maximum(
            jnp.dot(h.astype(weh_ref.dtype), weh_ref[...],
                    preferred_element_type=jnp.float32)
            + expo_ref[...] * wee_ref[...]
            + be_ref[...],
            0.0)
        emb_ref[...] = emb


@functools.partial(jax.jit,
                   static_argnames=("matmul_dtype", "a_dtype", "tile_n", "tile_k"))
def ine_forward(A, X, treatments, params, *,
                matmul_dtype=jnp.bfloat16, a_dtype=None,
                tile_n=None, tile_k=None):
    f32 = jnp.float32
    hi = jax.lax.Precision.HIGHEST
    N, _ = X.shape
    H = params["w_gcn"].shape[1]
    H_pad = _round_up(max(H, 1), 128)

    a_dt = a_dtype if a_dtype is not None else matmul_dtype
    a_item = jnp.dtype(a_dt).itemsize
    w_item = jnp.dtype(matmul_dtype).itemsize

    # ---- generation-aware VMEM budget (per-TensorCore) and tile choice
    try:
        vmem_cap = int(pltpu.get_tpu_info().vmem_capacity_bytes)
    except Exception:
        vmem_cap = 64 * 1024 * 1024          # conservative (v7x-sized) fallback

    def vmem_est(tn, tk):
        return (2 * tn * tk * a_item                 # A tile (double-buffered)
                + 2 * tk * H_pad * w_item            # xw tile
                + 2 * tn * H_pad * 4                 # emb output tile
                + tn * H_pad * 4                     # f32 accumulator scratch
                + 4 * tn * 4                         # d / exposure tiles
                + 2 * H_pad * H_pad * w_item         # W_emb block
                + 6 * H_pad * 4)                     # bias / exposure-row blocks

    n_pad128 = _round_up(N, 128)
    budget = vmem_cap // 2
    if tile_n is None or tile_k is None:
        t = 128
        for cand in (256, 512, 1024):
            if cand <= n_pad128 and vmem_est(cand, cand) <= budget:
                t = cand
        tile_n = t if tile_n is None else tile_n
        tile_k = t if tile_k is None else tile_k

    lcm = tile_n * tile_k // math.gcd(tile_n, tile_k)
    N_pad = _round_up(N, lcm)

    # ---- adjacency: cast ONCE to the kernel dtype, pad, fold the self-loop.
    diag = jnp.arange(N)
    one = jnp.ones((), a_dt)
    if N_pad == N and A.dtype == jnp.dtype(a_dt):
        A_in = A.at[diag, diag].set(one)
    else:
        A_in = (jnp.zeros((N_pad, N_pad), a_dt)
                .at[:N, :N].set(A.astype(a_dt))
                .at[diag, diag].set(one))

    # ---- single degree pass on the cast copy (0/1 exact, f32 accumulation)
    rs = jnp.sum(A_in[:N], axis=1, dtype=f32)      # = deg + 1 (self-loop included)
    d = 1.0 / jnp.sqrt(rs)                          # D_hat^{-1/2} (A symmetric)
    deg = rs - 1.0
    # module semantics: (A * t).sum(1)/(deg+1e-8) with t (N,1) == t*deg/(deg+1e-8)
    expo = treatments.reshape(N).astype(f32) * deg / (deg + 1e-8)

    # small O(N*F*H) feature transform, column-scaled by d
    xw_scaled = jnp.dot(X.astype(f32), params["w_gcn"].astype(f32),
                        precision=hi) * d[:, None]

    xw_pad = jnp.zeros((N_pad, H_pad), matmul_dtype).at[:N, :H].set(
        xw_scaled.astype(matmul_dtype))
    d_pad = jnp.zeros((N_pad, 1), f32).at[:N, 0].set(d)
    expo_pad = jnp.zeros((N_pad, 1), f32).at[:N, 0].set(expo)

    bg = jnp.zeros((1, H_pad), f32).at[:, :H].set(params["b_gcn"].reshape(1, H))
    weh = jnp.zeros((H_pad, H_pad), matmul_dtype).at[:H, :H].set(
        params["w_emb"][:H, :].astype(matmul_dtype))
    wee = jnp.zeros((1, H_pad), f32).at[:, :H].set(params["w_emb"][H:H + 1, :])
    be = jnp.zeros((1, H_pad), f32).at[:, :H].set(params["b_emb"].reshape(1, H))

    grid = (N_pad // tile_n, N_pad // tile_k)
    est = vmem_est(tile_n, tile_k)
    vmem_limit = int(min(vmem_cap * 7 // 8, max(48 * 1024 * 1024, 2 * est)))

    emb_p = pl.pallas_call(
        ine_kernel,
        grid=grid,
        in_specs=[
            pl.BlockSpec((tile_n, tile_k), lambda i, k: (i, k)),   # A_hat tile
            pl.BlockSpec((tile_k, H_pad), lambda i, k: (k, 0)),    # xw_scaled tile
            pl.BlockSpec((tile_n, 1), lambda i, k: (i, 0)),        # d_row
            pl.BlockSpec((tile_n, 1), lambda i, k: (i, 0)),        # exposure
            pl.BlockSpec((1, H_pad), lambda i, k: (0, 0)),         # b_gcn
            pl.BlockSpec((H_pad, H_pad), lambda i, k: (0, 0)),     # W_emb[:H]
            pl.BlockSpec((1, H_pad), lambda i, k: (0, 0)),         # W_emb[H] (exposure row)
            pl.BlockSpec((1, H_pad), lambda i, k: (0, 0)),         # b_emb
        ],
        out_specs=pl.BlockSpec((tile_n, H_pad), lambda i, k: (i, 0)),
        out_shape=jax.ShapeDtypeStruct((N_pad, H_pad), f32),
        scratch_shapes=[pltpu.VMEM((tile_n, H_pad), jnp.float32)],
        compiler_params=pltpu.CompilerParams(
            dimension_semantics=("parallel", "arbitrary"),
            vmem_limit_bytes=vmem_limit),
    )(A_in, xw_pad, d_pad, expo_pad, bg, weh, wee, be)

    emb = emb_p[:N, :H]

    # Tiny (N, H) @ (H, 2) head matmul in XLA: avoids a 64x write-amplified padded
    # head output from the kernel.
    w_heads = jnp.concatenate(
        [params["w_t0"].astype(f32), params["w_t1"].astype(f32)], axis=1)   # (H, 2)
    b_heads = jnp.concatenate(
        [params["b_t0"].reshape(1, 1), params["b_t1"].reshape(1, 1)], axis=1)
    y = jnp.dot(emb, w_heads, precision=hi) + b_heads
    return y[:, 0], y[:, 1], emb


def ine_reference(A, X, t, p):
    """Plain-JAX reference of the PyTorch forward (for verification)."""
    hi = jax.lax.Precision.HIGHEST
    N = A.shape[0]
    A_hat = A + jnp.eye(N, dtype=A.dtype)
    d = 1.0 / jnp.sqrt(jnp.sum(A_hat, axis=1))
    A_norm = d[:, None] * A_hat * d[None, :]
    xw = jnp.dot(X, p["w_gcn"], precision=hi)
    h = jax.nn.relu(jnp.dot(A_norm, xw, precision=hi) + p["b_gcn"])
    deg = A.sum(axis=1) + 1e-8
    exposure = ((A * t).sum(axis=1) / deg)[:, None]
    rep = jnp.concatenate([h, exposure], axis=1)
    emb = jax.nn.relu(jnp.dot(rep, p["w_emb"], precision=hi) + p["b_emb"])
    y0 = (jnp.dot(emb, p["w_t0"], precision=hi) + p["b_t0"]).reshape(-1)
    y1 = (jnp.dot(emb, p["w_t1"], precision=hi) + p["b_t1"]).reshape(-1)
    return y0, y1, emb


if __name__ == "__main__":
    # Small deterministic problem: N=256 nodes, F=8 features, H=32 hidden.
    N, F, H = 256, 8, 32
    key = jax.random.PRNGKey(0)
    k_adj, k_x, k_t, k1, k2, k3, k4, k5, k6, k7, k8 = jax.random.split(key, 11)

    # Symmetric 0/1 adjacency, zero diagonal (stand-in for the BA graph).
    upper = (jax.random.uniform(k_adj, (N, N)) < 0.05).astype(jnp.float32)
    A = jnp.triu(upper, k=1)
    A = A + A.T

    X = jax.random.normal(k_x, (N, F), dtype=jnp.float32)
    treatments = jax.random.bernoulli(k_t, p=0.1, shape=(N, 1)).astype(jnp.float32)

    # Deterministic parameter init (shapes from __init__: GCNConv(F,H),
    # Linear(H+1,H), Linear(H,1) x2), stored in (in, out) orientation.
    params = {
        "w_gcn": 0.1 * jax.random.normal(k1, (F, H), dtype=jnp.float32),
        "b_gcn": 0.1 * jax.random.normal(k2, (1, H), dtype=jnp.float32),
        "w_emb": 0.1 * jax.random.normal(k3, (H + 1, H), dtype=jnp.float32),
        "b_emb": 0.1 * jax.random.normal(k4, (1, H), dtype=jnp.float32),
        "w_t0": 0.1 * jax.random.normal(k5, (H, 1), dtype=jnp.float32),
        "b_t0": 0.1 * jax.random.normal(k6, (1, 1), dtype=jnp.float32),
        "w_t1": 0.1 * jax.random.normal(k7, (H, 1), dtype=jnp.float32),
        "b_t1": 0.1 * jax.random.normal(k8, (1, 1), dtype=jnp.float32),
    }

    y0_r, y1_r, emb_r = ine_reference(A, X, treatments, params)

    # ---- full-f32 kernel path with explicit small tiles (exercises the K
    #      accumulation across multiple grid steps): strict correctness check.
    y0, y1, emb = ine_forward(A, X, treatments, params,
                              matmul_dtype=jnp.float32, tile_n=128, tile_k=128)
    jax.block_until_ready((y0, y1, emb))
    np.testing.assert_allclose(np.asarray(y0), np.asarray(y0_r), rtol=1e-4, atol=1e-4)
    np.testing.assert_allclose(np.asarray(y1), np.asarray(y1_r), rtol=1e-4, atol=1e-4)
    np.testing.assert_allclose(np.asarray(emb), np.asarray(emb_r), rtol=1e-4, atol=1e-4)

    # ---- bf16 fast path (auto tile selection): A and xw/W_emb in bf16, f32 MXU
    #      accumulation; loose tolerance for bf16 rounding.
    y0b, y1b, embb = ine_forward(A, X, treatments, params,
                                 matmul_dtype=jnp.bfloat16)
    jax.block_until_ready((y0b, y1b, embb))
    np.testing.assert_allclose(np.asarray(y0b), np.asarray(y0_r), rtol=2e-2, atol=2e-2)
    np.testing.assert_allclose(np.asarray(y1b), np.asarray(y1_r), rtol=2e-2, atol=2e-2)
    np.testing.assert_allclose(np.asarray(embb), np.asarray(emb_r), rtol=2e-2, atol=2e-2)

    print("KERNEL_OK")
</pallas_src>

<mosaic_0001>
module attributes {stable_mosaic.version = 11 : i64} {
  func.func @ine_kernel(%arg0: i32, %arg1: i32, %arg2: memref<128x128xf32, #tpu.memory_space<vmem>>, %arg3: memref<128x128xf32, #tpu.memory_space<vmem>>, %arg4: memref<128x1xf32, #tpu.memory_space<vmem>>, %arg5: memref<128x1xf32, #tpu.memory_space<vmem>>, %arg6: memref<1x128xf32, #tpu.memory_space<vmem>>, %arg7: memref<128x128xf32, #tpu.memory_space<vmem>>, %arg8: memref<1x128xf32, #tpu.memory_space<vmem>>, %arg9: memref<1x128xf32, #tpu.memory_space<vmem>>, %arg10: memref<128x128xf32, #tpu.memory_space<vmem>>, %arg11: memref<128x128xf32, #tpu.memory_space<vmem>>) attributes {dimension_semantics = [#tpu.dimension_semantics<parallel>, #tpu.dimension_semantics<arbitrary>], iteration_bounds = array<i64: 2, 2>, scalar_prefetch = 0 : i64, scratch_operands = 1 : i64, tpu.core_type = #tpu.core_type<tc>, window_params = [{transform_indices = @transform_0, window_bounds = array<i64: 128, 128>}, {transform_indices = @transform_1, window_bounds = array<i64: 128, 128>}, {transform_indices = @transform_2, window_bounds = array<i64: 128, 1>}, {transform_indices = @transform_3, window_bounds = array<i64: 128, 1>}, {pipeline_mode = #tpu.pipeline_mode<synchronous>, transform_indices = @transform_4, window_bounds = array<i64: 1, 128>}, {pipeline_mode = #tpu.pipeline_mode<synchronous>, transform_indices = @transform_5, window_bounds = array<i64: 128, 128>}, {pipeline_mode = #tpu.pipeline_mode<synchronous>, transform_indices = @transform_6, window_bounds = array<i64: 1, 128>}, {pipeline_mode = #tpu.pipeline_mode<synchronous>, transform_indices = @transform_7, window_bounds = array<i64: 1, 128>}, {transform_indices = @transform_8, window_bounds = array<i64: 128, 128>}]} {
    %c0_i32 = arith.constant 0 : i32
    %0 = arith.cmpi eq, %arg1, %c0_i32 : i32
    %1 = arith.extui %0 : i1 to i32
    %c0_i32_0 = arith.constant 0 : i32
    %2 = arith.cmpi ne, %1, %c0_i32_0 : i32
    scf.if %2 {
      %cst_9 = arith.constant 0.000000e+00 : f32
      %12 = vector.broadcast %cst_9 : f32 to vector<128x128xf32>
      %c0_10 = arith.constant 0 : index
      %c0_11 = arith.constant 0 : index
      %13 = vector.load %arg11[%c0_10, %c0_11] : memref<128x128xf32, #tpu.memory_space<vmem>>, vector<128x128xf32>
      tpu.vector_store %arg11[%c0_10, %c0_11], %12 {strides = array<i32>} : memref<128x128xf32, #tpu.memory_space<vmem>>, vector<128x128xf32>,
    } else {
    }
    %c0 = arith.constant 0 : index
    %c0_1 = arith.constant 0 : index
    %3 = vector.load %arg2[%c0, %c0_1] : memref<128x128xf32, #tpu.memory_space<vmem>>, vector<128x128xf32>
    %c0_2 = arith.constant 0 : index
    %c0_3 = arith.constant 0 : index
    %4 = vector.load %arg11[%c0_2, %c0_3] : memref<128x128xf32, #tpu.memory_space<vmem>>, vector<128x128xf32>
    %c0_4 = arith.constant 0 : index
    %c0_5 = arith.constant 0 : index
    %5 = vector.load %arg3[%c0_4, %c0_5] : memref<128x128xf32, #tpu.memory_space<vmem>>, vector<128x128xf32>
    %cst = arith.constant dense<0.000000e+00> : vector<128x128xf32>
    %6 = tpu.matmul %3, %5, %cst {dimension_numbers = #tpu.dot_dimension_numbers<[1], [0], [0], [1], [0, 0, 1, 1], [], []>} : vector<128x128xf32>, vector<128x128xf32>, vector<128x128xf32> -> vector<128x128xf32>
    %7 = arith.addf %4, %6 : vector<128x128xf32>
    %c0_6 = arith.constant 0 : index
    %c0_7 = arith.constant 0 : index
    %8 = vector.load %arg11[%c0_6, %c0_7] : memref<128x128xf32, #tpu.memory_space<vmem>>, vector<128x128xf32>
    tpu.vector_store %arg11[%c0_6, %c0_7], %7 {strides = array<i32>} : memref<128x128xf32, #tpu.memory_space<vmem>>, vector<128x128xf32>,
    %c1_i32 = arith.constant 1 : i32
    %9 = arith.cmpi eq, %arg1, %c1_i32 : i32
    %10 = arith.extui %9 : i1 to i32
    %c0_i32_8 = arith.constant 0 : i32
    %11 = arith.cmpi ne, %10, %c0_i32_8 : i32
    scf.if %11 {
      %c0_9 = arith.constant 0 : index
      %c0_10 = arith.constant 0 : index
      %12 = vector.load %arg4[%c0_9, %c0_10] : memref<128x1xf32, #tpu.memory_space<vmem>>, vector<128x1xf32>
      %c0_11 = arith.constant 0 : index
      %c0_12 = arith.constant 0 : index
      %13 = vector.load %arg11[%c0_11, %c0_12] : memref<128x128xf32, #tpu.memory_space<vmem>>, vector<128x128xf32>
      %14 = vector.broadcast %12 : vector<128x1xf32> to vector<128x128xf32>
      %15 = arith.mulf %14, %13 : vector<128x128xf32>
      %c0_13 = arith.constant 0 : index
      %c0_14 = arith.constant 0 : index
      %16 = vector.load %arg6[%c0_13, %c0_14] : memref<1x128xf32, #tpu.memory_space<vmem>>, vector<1x128xf32>
      %17 = vector.broadcast %16 : vector<1x128xf32> to vector<128x128xf32>
      %18 = arith.addf %15, %17 : vector<128x128xf32>
      %cst_15 = arith.constant 0.000000e+00 : f32
      %19 = vector.broadcast %cst_15 : f32 to vector<128x128xf32>
      %20 = arith.maximumf %18, %19 : vector<128x128xf32>
      %c0_16 = arith.constant 0 : index
      %c0_17 = arith.constant 0 : index
      %21 = vector.load %arg7[%c0_16, %c0_17] : memref<128x128xf32, #tpu.memory_space<vmem>>, vector<128x128xf32>
      %cst_18 = arith.constant dense<0.000000e+00> : vector<128x128xf32>
      %22 = tpu.matmul %20, %21, %cst_18 {dimension_numbers = #tpu.dot_dimension_numbers<[1], [0], [0], [1], [0, 0, 1, 1], [], []>} : vector<128x128xf32>, vector<128x128xf32>, vector<128x128xf32> -> vector<128x128xf32>
      %c0_19 = arith.constant 0 : index
      %c0_20 = arith.constant 0 : index
      %23 = vector.load %arg5[%c0_19, %c0_20] : memref<128x1xf32, #tpu.memory_space<vmem>>, vector<128x1xf32>
      %c0_21 = arith.constant 0 : index
      %c0_22 = arith.constant 0 : index
      %24 = vector.load %arg8[%c0_21, %c0_22] : memref<1x128xf32, #tpu.memory_space<vmem>>, vector<1x128xf32>
      %25 = vector.broadcast %23 : vector<128x1xf32> to vector<128x128xf32>
      %26 = vector.broadcast %24 : vector<1x128xf32> to vector<128x128xf32>
      %27 = arith.mulf %25, %26 : vector<128x128xf32>
      %28 = arith.addf %22, %27 : vector<128x128xf32>
      %c0_23 = arith.constant 0 : index
      %c0_24 = arith.constant 0 : index
      %29 = vector.load %arg9[%c0_23, %c0_24] : memref<1x128xf32, #tpu.memory_space<vmem>>, vector<1x128xf32>
      %30 = vector.broadcast %29 : vector<1x128xf32> to vector<128x128xf32>
      %31 = arith.addf %28, %30 : vector<128x128xf32>
      %cst_25 = arith.constant 0.000000e+00 : f32
      %32 = vector.broadcast %cst_25 : f32 to vector<128x128xf32>
      %33 = arith.maximumf %31, %32 : vector<128x128xf32>
      %c0_26 = arith.constant 0 : index
      %c0_27 = arith.constant 0 : index
      %34 = vector.load %arg10[%c0_26, %c0_27] : memref<128x128xf32, #tpu.memory_space<vmem>>, vector<128x128xf32>
      tpu.vector_store %arg10[%c0_26, %c0_27], %33 {strides = array<i32>} : memref<128x128xf32, #tpu.memory_space<vmem>>, vector<128x128xf32>,
    } else {
    }
    return
  }
  func.func @transform_0(%arg0: i32, %arg1: i32) -> (i32, i32) {
    %c0_i32 = arith.constant 0 : i32
    return %arg0, %arg1 : i32, i32
  }
  func.func @transform_1(%arg0: i32, %arg1: i32) -> (i32, i32) {
    %c0_i32 = arith.constant 0 : i32
    %c0_i32_0 = arith.constant 0 : i32
    return %arg1, %c0_i32 : i32, i32
  }
  func.func @transform_2(%arg0: i32, %arg1: i32) -> (i32, i32) {
    %c0_i32 = arith.constant 0 : i32
    %c0_i32_0 = arith.constant 0 : i32
    return %arg0, %c0_i32 : i32, i32
  }
  func.func @transform_3(%arg0: i32, %arg1: i32) -> (i32, i32) {
    %c0_i32 = arith.constant 0 : i32
    %c0_i32_0 = arith.constant 0 : i32
    return %arg0, %c0_i32 : i32, i32
  }
  func.func @transform_4(%arg0: i32, %arg1: i32) -> (i32, i32) {
    %c0_i32 = arith.constant 0 : i32
    %c0_i32_0 = arith.constant 0 : i32
    %c0_i32_1 = arith.constant 0 : i32
    return %c0_i32, %c0_i32_0 : i32, i32
  }
  func.func @transform_5(%arg0: i32, %arg1: i32) -> (i32, i32) {
    %c0_i32 = arith.constant 0 : i32
    %c0_i32_0 = arith.constant 0 : i32
    %c0_i32_1 = arith.constant 0 : i32
    return %c0_i32, %c0_i32_0 : i32, i32
  }
  func.func @transform_6(%arg0: i32, %arg1: i32) -> (i32, i32) {
    %c0_i32 = arith.constant 0 : i32
    %c0_i32_0 = arith.constant 0 : i32
    %c0_i32_1 = arith.constant 0 : i32
    return %c0_i32, %c0_i32_0 : i32, i32
  }
  func.func @transform_7(%arg0: i32, %arg1: i32) -> (i32, i32) {
    %c0_i32 = arith.constant 0 : i32
    %c0_i32_0 = arith.constant 0 : i32
    %c0_i32_1 = arith.constant 0 : i32
    return %c0_i32, %c0_i32_0 : i32, i32
  }
  func.func @transform_8(%arg0: i32, %arg1: i32) -> (i32, i32) {
    %c0_i32 = arith.constant 0 : i32
    %c0_i32_0 = arith.constant 0 : i32
    return %arg0, %c0_i32 : i32, i32
  }
}

</mosaic_0001>

<bundles_post_ra>
// kernel: mul.0
= control target key start
LH: loop header
LB: loop body
LE: loop exit
PB: predicated region body
PF: predicated region fallthrough
CT: control target
= control target key end

     0   :  { %s56_s0 = inlined_call_operand.vmem [shape: f32[256,1], index: 0, kind: input, shape index: {}]   ;;  %s57_s1 = inlined_call_operand.vmem [shape: f32[256,1], index: 1, kind: input, shape index: {}]   ;;  %s58_s2 = inlined_call_operand.vmem [shape: f32[256,1], index: 2, kind: output, shape index: {}]  }
   0x1   :  { %v3_v0 = vld [vmem:[%s56_s0] sm:$0x1]  ;;  %v20_v2 = vld [vmem:[%s56_s0 + $0x1] sm:$0x1] }
   0x2   :  { %v4_v1 = vld [vmem:[%s57_s1] sm:$0x1]  ;;  %v21_v4 = vld [vmem:[%s57_s1 + $0x1] sm:$0x1] }
   0x3   :  { %v7_v3 = vmul.f32 %v4_v1, %v3_v0  ;;  %v16_v5 = vmul.f32 %v21_v4, %v20_v2 }
   0x5   :  { %9 = vst [vmem:[%s58_s2] sm:$0x1] %v7_v3  ;;  %22 = vst [vmem:[%s58_s2 + $0x1] sm:$0x1] %v16_v5 }

// kernel: div.0
= control target key start
LH: loop header
LB: loop body
LE: loop exit
PB: predicated region body
PF: predicated region fallthrough
CT: control target
= control target key end

     0   :  { %s812_s0 = inlined_call_operand.vmem [shape: f32[256,1], index: 0, kind: input, shape index: {}]   ;;  %s813_s1 = inlined_call_operand.vmem [shape: f32[256,1], index: 1, kind: input, shape index: {}]   ;;  %s814_s2 = inlined_call_operand.vmem [shape: f32[256,1], index: 2, kind: output, shape index: {}]  }
   0x1   :  { %v4_v0 = vld [vmem:[%s813_s1] sm:$0xff]  ;;  %v353_v1 = vld [vmem:[%s813_s1 + $0x8] sm:$0xff]  ;;  %v356_v2 = vld [vmem:[%s813_s1 + $0x10] sm:$0xff] }
   0x2   :  { %445 = vrcp.f32 %v4_v0  ;;  %v359_v3 = vld [vmem:[%s813_s1 + $0x18] sm:$0xff]  ;;  %v362_v4 = vld [vmem:[%s813_s1 + $0x20] sm:$0xff]  ;;  %v365_v5 = vld [vmem:[%s813_s1 + $0x28] sm:$0xff] }
   0x3   :  { %447 = vrcp.f32 %v353_v1  ;;  %v368_v6 = vld [vmem:[%s813_s1 + $0x30] sm:$0xff]  ;;  %v371_v7 = vld [vmem:[%s813_s1 + $0x38] sm:$0xff]  ;;  %v374_v8 = vld [vmem:[%s813_s1 + $0x40] sm:$0xff] }
   0x4   :  { %449 = vrcp.f32 %v356_v2  ;;  %v377_v9 = vld [vmem:[%s813_s1 + $0x48] sm:$0xff]  ;;  %v380_v10 = vld [vmem:[%s813_s1 + $0x50] sm:$0xff]  ;;  %v383_v11 = vld [vmem:[%s813_s1 + $0x58] sm:$0xff] }
   0x5   :  { %451 = vrcp.f32 %v359_v3  ;;  %v386_v12 = vld [vmem:[%s813_s1 + $0x60] sm:$0xff]  ;;  %v389_v13 = vld [vmem:[%s813_s1 + $0x68] sm:$0xff]  ;;  %v392_v15 = vld [vmem:[%s813_s1 + $0x70] sm:$0xff] }
   0x6   :  { %453 = vrcp.f32 %v362_v4  ;;  %v3_v14 = vld [vmem:[%s812_s0] sm:$0xff]  ;;  %v352_v16 = vld [vmem:[%s812_s0 + $0x8] sm:$0xff]  ;;  %v395_v17 = vld [vmem:[%s813_s1 + $0x78] sm:$0xff] }
   0x7   :  { %455 = vrcp.f32 %v365_v5  ;;  %v355_v19 = vld [vmem:[%s812_s0 + $0x10] sm:$0xff]  ;;  %v398_v20 = vld [vmem:[%s813_s1 + $0x80] sm:$0xff]  ;;  %v358_v23 = vld [vmem:[%s812_s0 + $0x18] sm:$0xff] }
   0x8   :  { %457 = vrcp.f32 %v368_v6  ;;  %v401_v24 = vld [vmem:[%s813_s1 + $0x88] sm:$0xff]  ;;  %v361_v27 = vld [vmem:[%s812_s0 + $0x20] sm:$0xff]  ;;  %v404_v28 = vld [vmem:[%s813_s1 + $0x90] sm:$0xff] }
   0x9   :  { %459 = vrcp.f32 %v371_v7  ;;  %v364_v31 = vld [vmem:[%s812_s0 + $0x28] sm:$0xff]  ;;  %v407_v32 = vld [vmem:[%s813_s1 + $0x98] sm:$0xff]  ;;  %v367_v35 = vld [vmem:[%s812_s0 + $0x30] sm:$0xff] }
   0xa   :  { %461 = vrcp.f32 %v374_v8  ;;  %v410_v36 = vld [vmem:[%s813_s1 + $0xa0] sm:$0xff]  ;;  %v370_v39 = vld [vmem:[%s812_s0 + $0x38] sm:$0xff]  ;;  %v413_v40 = vld [vmem:[%s813_s1 + $0xa8] sm:$0xff] }
   0xb   :  { %463 = vrcp.f32 %v377_v9  ;;  %v373_v43 = vld [vmem:[%s812_s0 + $0x40] sm:$0xff]  ;;  %v416_v44 = vld [vmem:[%s813_s1 + $0xb0] sm:$0xff]  ;;  %v376_v47 = vld [vmem:[%s812_s0 + $0x48] sm:$0xff] }
   0xc   :  { %465 = vrcp.f32 %v380_v10  ;;  %v419_v48 = vld [vmem:[%s813_s1 + $0xb8] sm:$0xff]  ;;  %v379_v51 = vld [vmem:[%s812_s0 + $0x50] sm:$0xff]  ;;  %v422_v52 = vld [vmem:[%s813_s1 + $0xc0] sm:$0xff] }
   0xd   :  { %467 = vrcp.f32 %v383_v11  ;;  %v382_v55 = vld [vmem:[%s812_s0 + $0x58] sm:$0xff]  ;;  %v425_v56 = vld [vmem:[%s813_s1 + $0xc8] sm:$0xff]  ;;  %v385_v59 = vld [vmem:[%s812_s0 + $0x60] sm:$0xff] }
   0xe   :  { %469 = vrcp.f32 %v386_v12  ;;  %v428_v60 = vld [vmem:[%s813_s1 + $0xd0] sm:$0xff]  ;;  %v388_v63 = vld [vmem:[%s812_s0 + $0x68] sm:$0xff]  ;;  %v431_v0 = vld [vmem:[%s813_s1 + $0xd8] sm:$0xff] }
   0xf   :  { %v446_v18 = vpop.eup %445  ;;  %471 = vrcp.f32 %v389_v13  ;;  %v391_v3 = vld [vmem:[%s812_s0 + $0x70] sm:$0xff]  ;;  %v434_v4 = vld [vmem:[%s813_s1 + $0xe0] sm:$0xff]  ;;  %v394_v7 = vld [vmem:[%s812_s0 + $0x78] sm:$0xff] }
  0x10   :  { %v448_v21 = vpop.eup %447  ;;  %v8_v22 = vmul.f32 %v446_v18, %v3_v14  ;;  %473 = vrcp.f32 %v392_v15  ;;  %v437_v8 = vld [vmem:[%s813_s1 + $0xe8] sm:$0xff]  ;;  %v397_v11 = vld [vmem:[%s812_s0 + $0x80] sm:$0xff]  ;;  %v440_v12 = vld [vmem:[%s813_s1 + $0xf0] sm:$0xff] }
  0x11   :  { %v450_v25 = vpop.eup %449  ;;  %v18_v26 = vmul.f32 %v448_v21, %v352_v16  ;;  %475 = vrcp.f32 %v395_v17  ;;  %v400_v15 = vld [vmem:[%s812_s0 + $0x88] sm:$0xff]  ;;  %v443_v16 = vld [vmem:[%s813_s1 + $0xf8] sm:$0xff] }
  0x12   :  { %v452_v29 = vpop.eup %451  ;;  %10 = vst [vmem:[%s814_s2] sm:$0xff] %v8_v22  ;;  %v29_v30 = vmul.f32 %v450_v25, %v355_v19  ;;  %477 = vrcp.f32 %v398_v20  ;;  %v403_v19 = vld [vmem:[%s812_s0 + $0x90] sm:$0xff]  ;;  %v406_v22 = vld [vmem:[%s812_s0 + $0x98] sm:$0xff]  ;;  %v409_v25 = vld [vmem:[%s812_s0 + $0xa0] sm:$0xff] }
  0x13   :  { %v454_v33 = vpop.eup %453  ;;  %354 = vst [vmem:[%s814_s2 + $0x8] sm:$0xff] %v18_v26  ;;  %v40_v34 = vmul.f32 %v452_v29, %v358_v23  ;;  %479 = vrcp.f32 %v401_v24 }
  0x14   :  { %v456_v37 = vpop.eup %455  ;;  %357 = vst [vmem:[%s814_s2 + $0x10] sm:$0xff] %v29_v30  ;;  %v51_v38 = vmul.f32 %v454_v33, %v361_v27  ;;  %481 = vrcp.f32 %v404_v28  ;;  %v412_v28 = vld [vmem:[%s812_s0 + $0xa8] sm:$0xff] }
  0x15   :  { %v458_v41 = vpop.eup %457  ;;  %360 = vst [vmem:[%s814_s2 + $0x18] sm:$0xff] %v40_v34  ;;  %v62_v42 = vmul.f32 %v456_v37, %v364_v31  ;;  %483 = vrcp.f32 %v407_v32  ;;  %v415_v31 = vld [vmem:[%s812_s0 + $0xb0] sm:$0xff]  ;;  %v418_v34 = vld [vmem:[%s812_s0 + $0xb8] sm:$0xff]  ;;  %v421_v37 = vld [vmem:[%s812_s0 + $0xc0] sm:$0xff] }
  0x16   :  { %v460_v45 = vpop.eup %459  ;;  %363 = vst [vmem:[%s814_s2 + $0x20] sm:$0xff] %v51_v38  ;;  %v73_v46 = vmul.f32 %v458_v41, %v367_v35  ;;  %485 = vrcp.f32 %v410_v36 }
  0x17   :  { %v462_v49 = vpop.eup %461  ;;  %366 = vst [vmem:[%s814_s2 + $0x28] sm:$0xff] %v62_v42  ;;  %v84_v50 = vmul.f32 %v460_v45, %v370_v39  ;;  %487 = vrcp.f32 %v413_v40  ;;  %v424_v40 = vld [vmem:[%s812_s0 + $0xc8] sm:$0xff] }
  0x18   :  { %v464_v53 = vpop.eup %463  ;;  %369 = vst [vmem:[%s814_s2 + $0x30] sm:$0xff] %v73_v46  ;;  %v95_v54 = vmul.f32 %v462_v49, %v373_v43  ;;  %489 = vrcp.f32 %v416_v44  ;;  %v427_v43 = vld [vmem:[%s812_s0 + $0xd0] sm:$0xff]  ;;  %v430_v46 = vld [vmem:[%s812_s0 + $0xd8] sm:$0xff]  ;;  %v433_v49 = vld [vmem:[%s812_s0 + $0xe0] sm:$0xff] }
  0x19   :  { %v466_v57 = vpop.eup %465  ;;  %372 = vst [vmem:[%s814_s2 + $0x38] sm:$0xff] %v84_v50  ;;  %v106_v58 = vmul.f32 %v464_v53, %v376_v47  ;;  %491 = vrcp.f32 %v419_v48 }
  0x1a   :  { %v468_v61 = vpop.eup %467  ;;  %375 = vst [vmem:[%s814_s2 + $0x40] sm:$0xff] %v95_v54  ;;  %v117_v62 = vmul.f32 %v466_v57, %v379_v51  ;;  %493 = vrcp.f32 %v422_v52  ;;  %v436_v52 = vld [vmem:[%s812_s0 + $0xe8] sm:$0xff] }
  0x1b   :  { %v470_v1 = vpop.eup %469  ;;  %378 = vst [vmem:[%s814_s2 + $0x48] sm:$0xff] %v106_v58  ;;  %v128_v2 = vmul.f32 %v468_v61, %v382_v55  ;;  %495 = vrcp.f32 %v425_v56  ;;  %v439_v55 = vld [vmem:[%s812_s0 + $0xf0] sm:$0xff]  ;;  %v442_v58 = vld [vmem:[%s812_s0 + $0xf8] sm:$0xff] }
  0x1c   :  { %v472_v5 = vpop.eup %471  ;;  %381 = vst [vmem:[%s814_s2 + $0x50] sm:$0xff] %v117_v62  ;;  %v139_v6 = vmul.f32 %v470_v1, %v385_v59  ;;  %497 = vrcp.f32 %v428_v60 }
  0x1d   :  { %v474_v9 = vpop.eup %473  ;;  %384 = vst [vmem:[%s814_s2 + $0x58] sm:$0xff] %v128_v2  ;;  %v150_v10 = vmul.f32 %v472_v5, %v388_v63  ;;  %499 = vrcp.f32 %v431_v0 }
  0x1e   :  { %v476_v13 = vpop.eup %475  ;;  %387 = vst [vmem:[%s814_s2 + $0x60] sm:$0xff] %v139_v6  ;;  %v161_v14 = vmul.f32 %v474_v9, %v391_v3  ;;  %501 = vrcp.f32 %v434_v4 }
  0x1f   :  { %v478_v17 = vpop.eup %477  ;;  %390 = vst [vmem:[%s814_s2 + $0x68] sm:$0xff] %v150_v10  ;;  %v172_v18 = vmul.f32 %v476_v13, %v394_v7  ;;  %503 = vrcp.f32 %v437_v8 }
  0x20   :  { %v480_v20 = vpop.eup %479  ;;  %393 = vst [vmem:[%s814_s2 + $0x70] sm:$0xff] %v161_v14  ;;  %v183_v21 = vmul.f32 %v478_v17, %v397_v11  ;;  %505 = vrcp.f32 %v440_v12 }
  0x21   :  { %v482_v23 = vpop.eup %481  ;;  %396 = vst [vmem:[%s814_s2 + $0x78] sm:$0xff] %v172_v18  ;;  %v194_v24 = vmul.f32 %v480_v20, %v400_v15  ;;  %507 = vrcp.f32 %v443_v16 }
  0x22   :  { %v484_v26 = vpop.eup %483  ;;  %399 = vst [vmem:[%s814_s2 + $0x80] sm:$0xff] %v183_v21  ;;  %v205_v27 = vmul.f32 %v482_v23, %v403_v19 }
  0x23   :  { %v486_v29 = vpop.eup %485  ;;  %402 = vst [vmem:[%s814_s2 + $0x88] sm:$0xff] %v194_v24  ;;  %v216_v30 = vmul.f32 %v484_v26, %v406_v22 }
  0x24   :  { %v488_v32 = vpop.eup %487  ;;  %405 = vst [vmem:[%s814_s2 + $0x90] sm:$0xff] %v205_v27  ;;  %v227_v33 = vmul.f32 %v486_v29, %v409_v25 }
  0x25   :  { %v490_v35 = vpop.eup %489  ;;  %408 = vst [vmem:[%s814_s2 + $0x98] sm:$0xff] %v216_v30  ;;  %v238_v36 = vmul.f32 %v488_v32, %v412_v28 }
  0x26   :  { %v492_v38 = vpop.eup %491  ;;  %411 = vst [vmem:[%s814_s2 + $0xa0] sm:$0xff] %v227_v33  ;;  %v249_v39 = vmul.f32 %v490_v35, %v415_v31 }
  0x27   :  { %v494_v41 = vpop.eup %493  ;;  %414 = vst [vmem:[%s814_s2 + $0xa8] sm:$0xff] %v238_v36  ;;  %v260_v42 = vmul.f32 %v492_v38, %v418_v34 }
  0x28   :  { %v496_v44 = vpop.eup %495  ;;  %417 = vst [vmem:[%s814_s2 + $0xb0] sm:$0xff] %v249_v39  ;;  %v271_v45 = vmul.f32 %v494_v41, %v421_v37 }
  0x29   :  { %v498_v47 = vpop.eup %497  ;;  %420 = vst [vmem:[%s814_s2 + $0xb8] sm:$0xff] %v260_v42  ;;  %v282_v48 = vmul.f32 %v496_v44, %v424_v40 }
  0x2a   :  { %v500_v50 = vpop.eup %499  ;;  %423 = vst [vmem:[%s814_s2 + $0xc0] sm:$0xff] %v271_v45  ;;  %v293_v51 = vmul.f32 %v498_v47, %v427_v43 }
  0x2b   :  { %v502_v53 = vpop.eup %501  ;;  %426 = vst [vmem:[%s814_s2 + $0xc8] sm:$0xff] %v282_v48  ;;  %v304_v54 = vmul.f32 %v500_v50, %v430_v46 }
  0x2c   :  { %v504_v56 = vpop.eup %503  ;;  %429 = vst [vmem:[%s814_s2 + $0xd0] sm:$0xff] %v293_v51  ;;  %v315_v57 = vmul.f32 %v502_v53, %v433_v49 }
  0x2d   :  { %v506_v59 = vpop.eup %505  ;;  %432 = vst [vmem:[%s814_s2 + $0xd8] sm:$0xff] %v304_v54  ;;  %v326_v60 = vmul.f32 %v504_v56, %v436_v52 }
  0x2e   :  { %v508_v61 = vpop.eup %507  ;;  %435 = vst [vmem:[%s814_s2 + $0xe0] sm:$0xff] %v315_v57  ;;  %v337_v62 = vmul.f32 %v506_v59, %v439_v55 }
  0x2f   :  { %438 = vst [vmem:[%s814_s2 + $0xe8] sm:$0xff] %v326_v60  ;;  %v348_v63 = vmul.f32 %v508_v61, %v442_v58 }
  0x30   :  { %441 = vst [vmem:[%s814_s2 + $0xf0] sm:$0xff] %v337_v62 }
  0x31   :  { %444 = vst [vmem:[%s814_s2 + $0xf8] sm:$0xff] %v348_v63 }

// kernel: ine_forward.1
= control target key start
LH: loop header
LB: loop body
LE: loop exit
PB: predicated region body
PF: predicated region fallthrough
CT: control target
= control target key end

     0   :  { %s2103_s0 = inlined_call_operand.vmem [shape: f32[256,256], index: 0, kind: input, shape index: {}]   ;;  %s2104_s1 = inlined_call_operand.vmem [shape: f32[256,128], index: 1, kind: input, shape index: {}]   ;;  %s2105_s2 = inlined_call_operand.vmem [shape: f32[256,1], index: 2, kind: input, shape index: {}]   ;;  %s2106_s3 = inlined_call_operand.vmem [shape: f32[256,1], index: 3, kind: input, shape index: {}]   ;;  %s2107_s4 = inlined_call_operand.vmem [shape: f32[1,128], index: 4, kind: input, shape index: {}]   ;;  %s2108_s5 = inlined_call_operand.vmem [shape: f32[128,128], index: 5, kind: input, shape index: {}]   ;;  %s2109_s6 = inlined_call_operand.vmem [shape: f32[1,128], index: 6, kind: input, shape index: {}]   ;;  %s2110_s7 = inlined_call_operand.vmem [shape: f32[1,128], index: 7, kind: input, shape index: {}]   ;;  %s2111_s8 = inlined_call_operand.vmem [shape: f32[256,128], index: 8, kind: output, shape index: {}]  }
   0x1   :  { %2113 = sst [smem:[#allocation5_spill]] %s2103_s0 }
   0x2   :  { %s1778_s27 = smov 0   ;;  %s1780_s28 = smov 0  }
   0x3   :  { %s1782_s29 = smov 0   ;;  %s1784_s30 = smov 0  }
   0x4   :  { %s1786_s9 = smov 0   ;;  %s1788_s10 = smov 0  }
   0x5   :  { %s1790_s11 = smov 0  }
   0x6 LB: > { %s27_s12 = sadd.s32 1, %s1721_s9  ;;  %s30_s13 = sadd.s32 1, %s1725_s10  ;;  %s1729_s11 = sphi %s1790_s11, %s18_s11   ;;  %s1725_s10 = sphi %s1788_s10, %s2122_s10   ;;  %s1721_s9 = sphi %s1786_s9, %s2121_s9   ;;  %s1717_s30 = sphi %s1784_s30, %s2120_s30   ;;  %s1713_s29 = sphi %s1782_s29, %s2119_s29   ;;  %s1709_s28 = sphi %s1780_s28, %s2118_s28   ;;  %s1705_s27 = sphi %s1778_s27, %s2117_s27  }
   0x7   : > { %p28_p0 = scmp.ge.s32.totalorder %s27_s12, 2  ;;  %p46_p1 = scmp.ne.s32.totalorder %s1709_s28, %s1705_s27 }
   0x8   : > { %p47_p2 = scmp.eq.s32.totalorder %s1729_s11, 0  ;;  %s39_s17 = sadd.s32 1, %s1709_s28 }
   0x9   : > { %s2124_s12 = smov (%p28_p0, %s27_s12), 0  ;;  %s2126_s13 = smov (!%p28_p0, %s30_s13), %s1725_s10 }
   0xa   : > { %p48_p3 = por %p47_p2, %p46_p1  ;;  %p32_p4 = scmp.ge.s32.totalorder %s2126_s13, 2 }
   0xb   : > { %s35_s14 = ssub.s32 %s1721_s9, %s2124_s12  ;;  %p1352_p6 = scmp.ge.s32.totalorder %s1729_s11, 4 }
   0xc   : > { %s2128_s13 = smov (%p32_p4, %s2126_s13), 0 }
   0xd   : > { %2114 = sst [smem:[#allocation4_spill]] %s2128_s13  ;;  %s34_s15 = ssub.s32 %s1725_s10, %s2128_s13 }
   0xe   : > { %s36_s16 = sor.u32 %s35_s14, %s34_s15  ;;  %272 = sbr.rel (%p1352_p6) target bundleno = 37 (0x25), region = 32 }
   0xf   : > { %p37_p5 = scmp.eq.s32.totalorder %s36_s16, 0 }
  0x11   : > { %s1829_s18 = scalar_select %p37_p5, %s1709_s28, %s39_s17  }
  0x13   : > { %275 = sbr.rel (!%p48_p3) target bundleno = 37 (0x25), region = 36  ;;  %s277_s19 = sand.u32 (%p48_p3), 1, %s1709_s28  }
  0x14   : > { %s1374_s20 = sshll.u32 (%p48_p3), %s1725_s10, 5  ;;  %s1353_s21 = sshll.u32 (%p48_p3), %s277_s19, 7 }
  0x15   : > { %s282_s22 = sadd.s32 (%p48_p3), %s1721_s9, %s1374_s20  ;;  %s2115_s0 = sld [smem:[#allocation5_spill]] (%p48_p3) }
  0x16   : > { %s1356_s23 = sshll.u32 (%p48_p3), %s282_s22, 3  ;;  %s279_s14 = scalar_lea.vmem (%p48_p3), [#allocation3], %s1353_s21 }
  0x1b   : > { %s1838_s26 = scalar_lea.vmem %s2115_s0, %s1356_s23 }
  0x1c   : > { %v343_v0 = vld [vmem:[%s1838_s26] sm:$0xff]  ;;  %v345_v1 = vld [vmem:[%s1838_s26 + $0x10] sm:$0xff] }
  0x1d   : > { %v347_v2 = vld [vmem:[%s1838_s26 + $0x20] sm:$0xff]  ;;  %344 = vst [vmem:[%s279_s14] sm:$0xff] %v343_v0  ;;  %346 = vst [vmem:[%s279_s14 + $0x8] sm:$0xff] %v345_v1  ;;  %v349_v3 = vld [vmem:[%s1838_s26 + $0x30] sm:$0xff] }
  0x1e   : > { %348 = vst [vmem:[%s279_s14 + $0x10] sm:$0xff] %v347_v2  ;;  %v351_v4 = vld [vmem:[%s1838_s26 + $0x40] sm:$0xff]  ;;  %v353_v5 = vld [vmem:[%s1838_s26 + $0x50] sm:$0xff]  ;;  %350 = vst [vmem:[%s279_s14 + $0x18] sm:$0xff] %v349_v3 }
  0x1f   : > { %352 = vst [vmem:[%s279_s14 + $0x20] sm:$0xff] %v351_v4  ;;  %354 = vst [vmem:[%s279_s14 + $0x28] sm:$0xff] %v353_v5  ;;  %v355_v6 = vld [vmem:[%s1838_s26 + $0x60] sm:$0xff]  ;;  %v357_v7 = vld [vmem:[%s1838_s26 + $0x70] sm:$0xff] }
  0x20   : > { %v359_v8 = vld [vmem:[%s1838_s26 + $0x80] sm:$0xff]  ;;  %356 = vst [vmem:[%s279_s14 + $0x30] sm:$0xff] %v355_v6  ;;  %358 = vst [vmem:[%s279_s14 + $0x38] sm:$0xff] %v357_v7  ;;  %v361_v9 = vld [vmem:[%s1838_s26 + $0x90] sm:$0xff] }
  0x21   : > { %360 = vst [vmem:[%s279_s14 + $0x40] sm:$0xff] %v359_v8  ;;  %v363_v10 = vld [vmem:[%s1838_s26 + $0xa0] sm:$0xff]  ;;  %v365_v11 = vld [vmem:[%s1838_s26 + $0xb0] sm:$0xff]  ;;  %362 = vst [vmem:[%s279_s14 + $0x48] sm:$0xff] %v361_v9 }
  0x22   : > { %364 = vst [vmem:[%s279_s14 + $0x50] sm:$0xff] %v363_v10  ;;  %366 = vst [vmem:[%s279_s14 + $0x58] sm:$0xff] %v365_v11  ;;  %v367_v12 = vld [vmem:[%s1838_s26 + $0xc0] sm:$0xff]  ;;  %v369_v13 = vld [vmem:[%s1838_s26 + $0xd0] sm:$0xff] }
  0x23   : > { %v371_v14 = vld [vmem:[%s1838_s26 + $0xe0] sm:$0xff]  ;;  %368 = vst [vmem:[%s279_s14 + $0x60] sm:$0xff] %v367_v12  ;;  %370 = vst [vmem:[%s279_s14 + $0x68] sm:$0xff] %v369_v13  ;;  %v373_v15 = vld [vmem:[%s1838_s26 + $0xf0] sm:$0xff] }
  0x24   : > { %372 = vst [vmem:[%s279_s14 + $0x70] sm:$0xff] %v371_v14  ;;  %374 = vst [vmem:[%s279_s14 + $0x78] sm:$0xff] %v373_v15 }
  0x25 PF: > { %p1357_p7 = scmp.ge.s32.totalorder %s1729_s11, 1  ;;  %p406_p8 = scmp.lt.s32.totalorder %s1729_s11, 5 }
  0x27   : > { %p407_p9 = pnand %p1357_p7, %p406_p8 }
  0x28   : > { %s413_s15 = sand.u32 (!%p407_p9), 1, %s1705_s27   ;;  %s1359_s16 = sshll.u32 (!%p407_p9), %s1713_s29, 4 }
  0x29   : > { %410 = sbr.rel (%p407_p9) target bundleno = 670 (0x29e), region = 86  ;;  %s1358_s17 = sshll.u32 (!%p407_p9), %s413_s15, 7 }
  0x2a   : > { %p463_p10 = scmp.lt.s32.totalorder (!%p407_p9), %s1359_s16, 31  ;;  %s1361_s19 = sshll.u32 (!%p407_p9), %s1717_s30, 4 }
  0x2b   : > { %p469_p11 = scmp.lt.s32.totalorder (!%p407_p9), %s1361_s19, 31  ;;  %s1881_s21 = scalar_lea.vmem (!%p407_p9), [#allocation3], %s1358_s17 }
  0x2c   : > { %p1367_p12 = scmp.ne.s32.totalorder (!%p407_p9), %s1713_s29, 0 }
  0x2e   : > { %s2130_s16 = smov (!%p463_p10, %s1359_s16), 31  ;;  %s2132_s19 = smov (!%p469_p11, %s1361_s19), 31 }
  0x2f   : > { %s1360_s20 = sshll.u32 %s2130_s16, 3  ;;  %s1362_s24 = sshll.u32 %s2132_s19, 3 }
  0x30   : > { %s1864_s23 = scalar_lea.vmem %s2104_s1, %s1360_s20  ;;  %s1869_s14 = scalar_lea.vmem %s2105_s2, %s1362_s24 }
  0x31   : > { %s1874_s15 = scalar_lea.vmem %s2106_s3, %s1362_s24  ;;  %s1879_s16 = scalar_lea.vmem %s2111_s8, %s1362_s24 }
  0x32   : > { %489 = sbr.rel (%p1367_p12) target bundleno = 64 (0x40), region = 94 }
  0x37   : > { %v1731_v16 = vmov 0.0  }
  0x38   : > { %490 = vst [vmem:[#allocation2 + $0x30] sm:$0xff] %v1731_v16  ;;  %491 = vst [vmem:[#allocation2] sm:$0xff] %v1731_v16 }
  0x39   : > { %492 = vst [vmem:[#allocation2 + $0x58] sm:$0xff] %v1731_v16  ;;  %493 = vst [vmem:[#allocation2 + $0x18] sm:$0xff] %v1731_v16 }
  0x3a   : > { %494 = vst [vmem:[#allocation2 + $0x50] sm:$0xff] %v1731_v16  ;;  %495 = vst [vmem:[#allocation2 + $0x68] sm:$0xff] %v1731_v16 }
  0x3b   : > { %496 = vst [vmem:[#allocation2 + $0x8] sm:$0xff] %v1731_v16  ;;  %497 = vst [vmem:[#allocation2 + $0x48] sm:$0xff] %v1731_v16 }
  0x3c   : > { %498 = vst [vmem:[#allocation2 + $0x40] sm:$0xff] %v1731_v16  ;;  %499 = vst [vmem:[#allocation2 + $0x20] sm:$0xff] %v1731_v16 }
  0x3d   : > { %500 = vst [vmem:[#allocation2 + $0x10] sm:$0xff] %v1731_v16  ;;  %501 = vst [vmem:[#allocation2 + $0x38] sm:$0xff] %v1731_v16 }
  0x3e   : > { %502 = vst [vmem:[#allocation2 + $0x60] sm:$0xff] %v1731_v16  ;;  %503 = vst [vmem:[#allocation2 + $0x70] sm:$0xff] %v1731_v16 }
  0x3f   : > { %504 = vst [vmem:[#allocation2 + $0x78] sm:$0xff] %v1731_v16  ;;  %505 = vst [vmem:[#allocation2 + $0x28] sm:$0xff] %v1731_v16 }
  0x40 PF: > { %v553_v17 = vld [vmem:[%s1864_s23 + $0x78] sm:$0xff]  ;;  %v552_v18 = vld [vmem:[%s1864_s23 + $0x70] sm:$0xff]  ;;  %v551_v19 = vld [vmem:[%s1864_s23 + $0x68] sm:$0xff]  ;;  %p1368_p13 = scmp.ne.s32.totalorder %s1713_s29, 1 }
  0x41   : > { %1439 = vmatprep.subr.mxu0 %v553_v17  ;;  %1551 = vmatprep.subr.mxu1 %v553_v17  ;;  %v550_v20 = vld [vmem:[%s1864_s23 + $0x60] sm:$0xff]  ;;  %v549_v21 = vld [vmem:[%s1864_s23 + $0x58] sm:$0xff]  ;;  %v548_v22 = vld [vmem:[%s1864_s23 + $0x50] sm:$0xff] }
  0x42   : > { %1440 = vmatpush3.msra.mxu0 %v553_v17  ;;  %1567 = vmatpush3.msra.mxu1 %v553_v17  ;;  %v547_v23 = vld [vmem:[%s1864_s23 + $0x48] sm:$0xff]  ;;  %v546_v24 = vld [vmem:[%s1864_s23 + $0x40] sm:$0xff]  ;;  %v545_v25 = vld [vmem:[%s1864_s23 + $0x38] sm:$0xff] }
  0x43   : > { %1441 = vmatprep.subr.mxu0 %v552_v18  ;;  %1552 = vmatprep.subr.mxu1 %v552_v18  ;;  %v544_v26 = vld [vmem:[%s1864_s23 + $0x30] sm:$0xff]  ;;  %v543_v27 = vld [vmem:[%s1864_s23 + $0x28] sm:$0xff]  ;;  %v542_v28 = vld [vmem:[%s1864_s23 + $0x20] sm:$0xff] }
  0x44   : > { %1442 = vmatpush3.msra.mxu0 %v552_v18  ;;  %1568 = vmatpush3.msra.mxu1 %v552_v18  ;;  %v541_v29 = vld [vmem:[%s1864_s23 + $0x18] sm:$0xff]  ;;  %v540_v30 = vld [vmem:[%s1864_s23 + $0x10] sm:$0xff]  ;;  %v539_v31 = vld [vmem:[%s1864_s23 + $0x8] sm:$0xff] }
  0x45   : > { %1443 = vmatprep.subr.mxu0 %v551_v19  ;;  %1553 = vmatprep.subr.mxu1 %v551_v19  ;;  %v538_v32 = vld [vmem:[%s1864_s23] sm:$0xff]  ;;  %v507_v35 = vld [vmem:[%s1881_s21 + $0x8] sm:$0xff]  ;;  %v508_v37 = vld [vmem:[%s1881_s21 + $0x10] sm:$0xff] }
  0x46   : > { %1444 = vmatpush3.msra.mxu0 %v551_v19  ;;  %1569 = vmatpush3.msra.mxu1 %v551_v19  ;;  %v506_v33 = vld [vmem:[%s1881_s21] sm:$0xff]  ;;  %v515_v36 = vld [vmem:[%s1881_s21 + $0x48] sm:$0xff]  ;;  %v516_v38 = vld [vmem:[%s1881_s21 + $0x50] sm:$0xff] }
  0x47   : > { %1445 = vmatprep.subr.mxu0 %v550_v20  ;;  %1554 = vmatprep.subr.mxu1 %v550_v20  ;;  %v514_v34 = vld [vmem:[%s1881_s21 + $0x40] sm:$0xff]  ;;  %v509_v39 = vld [vmem:[%s1881_s21 + $0x18] sm:$0xff]  ;;  %v511_v43 = vld [vmem:[%s1881_s21 + $0x28] sm:$0xff] }
  0x48   : > { %1446 = vmatpush3.msra.mxu0 %v550_v20  ;;  %1570 = vmatpush3.msra.mxu1 %v550_v20  ;;  %v517_v40 = vld [vmem:[%s1881_s21 + $0x58] sm:$0xff]  ;;  %v510_v41 = vld [vmem:[%s1881_s21 + $0x20] sm:$0xff]  ;;  %v519_v44 = vld [vmem:[%s1881_s21 + $0x68] sm:$0xff] }
  0x49   : > { %1447 = vmatprep.subr.mxu0 %v549_v21  ;;  %1555 = vmatprep.subr.mxu1 %v549_v21  ;;  %v518_v42 = vld [vmem:[%s1881_s21 + $0x60] sm:$0xff]  ;;  %v512_v45 = vld [vmem:[%s1881_s21 + $0x30] sm:$0xff]  ;;  %v513_v47 = vld [vmem:[%s1881_s21 + $0x38] sm:$0xff] }
  0x4a   : > { %1448 = vmatpush3.msra.mxu0 %v549_v21  ;;  %1571 = vmatpush3.msra.mxu1 %v549_v21  ;;  %v520_v46 = vld [vmem:[%s1881_s21 + $0x70] sm:$0xff]  ;;  %v521_v48 = vld [vmem:[%s1881_s21 + $0x78] sm:$0xff]  ;;  %v523_v49 = vld [vmem:[#allocation2] sm:$0xff] }
  0x4b   : > { %1449 = vmatprep.subr.mxu0 %v548_v22  ;;  %1556 = vmatprep.subr.mxu1 %v548_v22  ;;  %v531_v50 = vld [vmem:[#allocation2 + $0x20] sm:$0xff]  ;;  %v522_v53 = vld [vmem:[#allocation2 + $0x30] sm:$0xff]  ;;  %v525_v59 = vld [vmem:[#allocation2 + $0x18] sm:$0xff] }
  0x4c   : > { %1450 = vmatpush3.msra.mxu0 %v548_v22  ;;  %1572 = vmatpush3.msra.mxu1 %v548_v22  ;;  %v530_v54 = vld [vmem:[#allocation2 + $0x40] sm:$0xff]  ;;  %v533_v60 = vld [vmem:[#allocation2 + $0x38] sm:$0xff]  ;;  %v532_v2 = vld [vmem:[#allocation2 + $0x10] sm:$0xff] }
  0x4d   : > { %1451 = vmatprep.subr.mxu0 %v547_v23  ;;  %1557 = vmatprep.subr.mxu1 %v547_v23  ;;  %v524_v1 = vld [vmem:[#allocation2 + $0x58] sm:$0xff]  ;;  %v527_v7 = vld [vmem:[#allocation2 + $0x68] sm:$0xff]  ;;  %v535_v8 = vld [vmem:[#allocation2 + $0x70] sm:$0xff] }
  0x4e   : > { %1452 = vmatpush3.msra.mxu0 %v547_v23  ;;  %1573 = vmatpush3.msra.mxu1 %v547_v23  ;;  %v526_v13 = vld [vmem:[#allocation2 + $0x50] sm:$0xff]  ;;  %v534_v14 = vld [vmem:[#allocation2 + $0x60] sm:$0xff]  ;;  %v529_v19 = vld [vmem:[#allocation2 + $0x48] sm:$0xff] }
  0x4f   : > { %1453 = vmatprep.subr.mxu0 %v546_v24  ;;  %1558 = vmatprep.subr.mxu1 %v546_v24  ;;  %v537_v20 = vld [vmem:[#allocation2 + $0x28] sm:$0xff] }
  0x50   : > { %1454 = vmatpush3.msra.mxu0 %v546_v24  ;;  %1574 = vmatpush3.msra.mxu1 %v546_v24 }
  0x51   : > { %1455 = vmatprep.subr.mxu0 %v545_v25  ;;  %1559 = vmatprep.subr.mxu1 %v545_v25 }
  0x52   : > { %1456 = vmatpush3.msra.mxu0 %v545_v25  ;;  %1575 = vmatpush3.msra.mxu1 %v545_v25  ;;  %v528_v25 = vld [vmem:[#allocation2 + $0x8] sm:$0xff] }
  0x53   : > { %1457 = vmatprep.subr.mxu0 %v544_v26  ;;  %1560 = vmatprep.subr.mxu1 %v544_v26 }
  0x54   : > { %1458 = vmatpush3.msra.mxu0 %v544_v26  ;;  %1576 = vmatpush3.msra.mxu1 %v544_v26  ;;  %v536_v26 = vld [vmem:[#allocation2 + $0x78] sm:$0xff] }
  0x55   : > { %1459 = vmatprep.subr.mxu0 %v543_v27  ;;  %1561 = vmatprep.subr.mxu1 %v543_v27 }
  0x56   : > { %1460 = vmatpush3.msra.mxu0 %v543_v27  ;;  %1577 = vmatpush3.msra.mxu1 %v543_v27 }
  0x57   : > { %1461 = vmatprep.subr.mxu0 %v542_v28  ;;  %1562 = vmatprep.subr.mxu1 %v542_v28 }
  0x58   : > { %1462 = vmatpush3.msra.mxu0 %v542_v28  ;;  %1578 = vmatpush3.msra.mxu1 %v542_v28 }
  0x59   : > { %1463 = vmatprep.subr.mxu0 %v541_v29  ;;  %1563 = vmatprep.subr.mxu1 %v541_v29 }
  0x5a   : > { %1464 = vmatpush3.msra.mxu0 %v541_v29  ;;  %1579 = vmatpush3.msra.mxu1 %v541_v29 }
  0x5b   : > { %1465 = vmatprep.subr.mxu0 %v540_v30  ;;  %1564 = vmatprep.subr.mxu1 %v540_v30 }
  0x5c   : > { %1466 = vmatpush3.msra.mxu0 %v540_v30  ;;  %1580 = vmatpush3.msra.mxu1 %v540_v30 }
  0x5d   : > { %1467 = vmatprep.subr.mxu0 %v539_v31  ;;  %1565 = vmatprep.subr.mxu1 %v539_v31 }
  0x5e   : > { %1468 = vmatpush3.msra.mxu0 %v539_v31  ;;  %1581 = vmatpush3.msra.mxu1 %v539_v31 }
  0x5f   : > { %1469 = vmatprep.subr.mxu0 %v538_v32  ;;  %1566 = vmatprep.subr.mxu1 %v538_v32 }
  0x60   : > { %1470 = vmatpush3.msra.mxu0 %v538_v32  ;;  %1582 = vmatpush3.msra.mxu1 %v538_v32 }
  0x61   : > { %1471 = vmatprep.mubr.f32.mxu0 %v506_v33  ;;  %1483 = vmatprep.mubr.f32.mxu1 %v514_v34 }
  0x62   : > { %1472 = vmatmul.mubr.f32.vlgmr.msra.gmra.mxu0 %v507_v35  ;;  %1484 = vmatmul.mubr.f32.vlgmr.msra.gmra.mxu1 %v515_v36 }
  0x63   : > { %1474 = vmatprep.mubr.f32.mxu0 %v508_v37  ;;  %1486 = vmatprep.mubr.f32.mxu1 %v516_v38 }
  0x66   : > { %1475 = vmatmul.mubr.f32.gmra.mxu0 %v509_v39  ;;  %1487 = vmatmul.mubr.f32.gmra.mxu1 %v517_v40 }
  0x67   : > { %1477 = vmatprep.mubr.f32.mxu0 %v510_v41  ;;  %1489 = vmatprep.mubr.f32.mxu1 %v518_v42 }
  0x6a   : > { %1478 = vmatmul.mubr.f32.gmra.mxu0 %v511_v43  ;;  %1490 = vmatmul.mubr.f32.gmra.mxu1 %v519_v44 }
  0x6b   : > { %1480 = vmatprep.mubr.f32.mxu0 %v512_v45  ;;  %1492 = vmatprep.mubr.f32.mxu1 %v520_v46 }
  0x6e   : > { %1481 = vmatmul.mubr.f32.gmra.mxu0 %v513_v47  ;;  %1493 = vmatmul.mubr.f32.gmra.mxu1 %v521_v48 }
 0x122   : > { %v1473_v51 = vpop.f32.mrf.mxu0  ;;  %v1485_v52 = vpop.f32.mrf.mxu1 }
 0x123   : > { %v700_v55 = vadd.f32 %v1473_v51, %v523_v49  ;;  %v708_v56 = vadd.f32 %v1485_v52, %v531_v50 }
 0x124   : > { %v620_v57 = vpop.f32.mrf.mxu0  ;;  %v660_v58 = vpop.f32.mrf.mxu1 }
 0x125   : > { %716 = vst [vmem:[#allocation2] sm:$0xff] %v700_v55  ;;  %724 = vst [vmem:[#allocation2 + $0x20] sm:$0xff] %v708_v56  ;;  %v699_v61 = vadd.f32 %v620_v57, %v522_v53  ;;  %v707_v62 = vadd.f32 %v660_v58, %v530_v54 }
 0x126   : > { %v1476_v63 = vpop.f32.mrf.mxu0  ;;  %v1488_v0 = vpop.f32.mrf.mxu1 }
 0x127   : > { %715 = vst [vmem:[#allocation2 + $0x30] sm:$0xff] %v699_v61  ;;  %723 = vst [vmem:[#allocation2 + $0x40] sm:$0xff] %v707_v62  ;;  %v702_v3 = vadd.f32 %v1476_v63, %v525_v59  ;;  %v710_v4 = vadd.f32 %v1488_v0, %v533_v60 }
 0x128   : > { %v630_v5 = vpop.f32.mrf.mxu0  ;;  %v670_v6 = vpop.f32.mrf.mxu1 }
 0x129   : > { %718 = vst [vmem:[#allocation2 + $0x18] sm:$0xff] %v702_v3  ;;  %726 = vst [vmem:[#allocation2 + $0x38] sm:$0xff] %v710_v4  ;;  %v701_v9 = vadd.f32 %v630_v5, %v524_v1  ;;  %v709_v10 = vadd.f32 %v670_v6, %v532_v2 }
 0x12a   : > { %v1479_v11 = vpop.f32.mrf.mxu0  ;;  %v1491_v12 = vpop.f32.mrf.mxu1 }
 0x12b   : > { %717 = vst [vmem:[#allocation2 + $0x58] sm:$0xff] %v701_v9  ;;  %725 = vst [vmem:[#allocation2 + $0x10] sm:$0xff] %v709_v10  ;;  %v704_v15 = vadd.f32 %v1479_v11, %v527_v7  ;;  %v712_v16 = vadd.f32 %v1491_v12, %v535_v8 }
 0x12c   : > { %v640_v17 = vpop.f32.mrf.mxu0  ;;  %v680_v18 = vpop.f32.mrf.mxu1 }
 0x12d   : > { %720 = vst [vmem:[#allocation2 + $0x68] sm:$0xff] %v704_v15  ;;  %728 = vst [vmem:[#allocation2 + $0x70] sm:$0xff] %v712_v16  ;;  %v703_v21 = vadd.f32 %v640_v17, %v526_v13  ;;  %v711_v22 = vadd.f32 %v680_v18, %v534_v14 }
 0x12e   : > { %v1482_v23 = vpop.f32.mrf.mxu0  ;;  %v1494_v24 = vpop.f32.mrf.mxu1 }
 0x12f   : > { %719 = vst [vmem:[#allocation2 + $0x50] sm:$0xff] %v703_v21  ;;  %727 = vst [vmem:[#allocation2 + $0x60] sm:$0xff] %v711_v22  ;;  %v706_v27 = vadd.f32 %v1482_v23, %v529_v19  ;;  %v714_v28 = vadd.f32 %v1494_v24, %v537_v20  ;;  %734 = sbr.rel (%p1368_p13) target bundleno = 670 (0x29e), region = 98 }
 0x130   : > { %v650_v29 = vpop.f32.mrf.mxu0  ;;  %v690_v30 = vpop.f32.mrf.mxu1 }
 0x131   : > { %722 = vst [vmem:[#allocation2 + $0x48] sm:$0xff] %v706_v27  ;;  %730 = vst [vmem:[#allocation2 + $0x28] sm:$0xff] %v714_v28  ;;  %v705_v31 = vadd.f32 %v650_v29, %v528_v25  ;;  %v713_v32 = vadd.f32 %v690_v30, %v536_v26 }
 0x133   : > { %721 = vst [vmem:[#allocation2 + $0x8] sm:$0xff] %v705_v31  ;;  %729 = vst [vmem:[#allocation2 + $0x78] sm:$0xff] %v713_v32 }
 0x134   : > { %v736_v33 = vld [vmem:[%s1869_s14 + $0x8] sm:$0xff]  ;;  %v735_v34 = vld [vmem:[%s1869_s14] sm:$0xff]  ;;  %v1732_v35 = vmov 0   ;;  %v745_v38 = vld [vmem:[%s1869_s14 + $0x50] sm:$0xff] }
 0x135   : > { %1674 = vset.pattern.permute.xlu1 %v1732_v35  ;;  %1673 = vset.pattern.permute.xlu0 %v1732_v35  ;;  %v744_v36 = vld [vmem:[%s1869_s14 + $0x48] sm:$0xff]  ;;  %v743_v37 = vld [vmem:[%s1869_s14 + $0x40] sm:$0xff]  ;;  %v737_v39 = vld [vmem:[%s1869_s14 + $0x10] sm:$0xff] }
 0x136   : > { %774 = vperm.xlu1 %1674, %v736_v33   ;;  %769 = vperm.xlu0 %1673, %v735_v34   ;;  %v917_v40 = vld [vmem:[%s2108_s5 + $0x78] sm:$0xff]  ;;  %v916_v43 = vld [vmem:[%s2108_s5 + $0x70] sm:$0xff]  ;;  %v915_v44 = vld [vmem:[%s2108_s5 + $0x68] sm:$0xff] }
 0x137   : > { %v746_v41 = vld [vmem:[%s1869_s14 + $0x58] sm:$0xff]  ;;  %1495 = vmatprep.subr.mxu0 %v917_v40  ;;  %1583 = vmatprep.subr.mxu1 %v917_v40  ;;  %v747_v45 = vld [vmem:[%s1869_s14 + $0x60] sm:$0xff]  ;;  %v748_v49 = vld [vmem:[%s1869_s14 + $0x68] sm:$0xff] }
 0x138   : > { %v738_v42 = vld [vmem:[%s1869_s14 + $0x18] sm:$0xff]  ;;  %1496 = vmatpush3.msra.mxu0 %v917_v40  ;;  %1599 = vmatpush3.msra.mxu1 %v917_v40  ;;  %v739_v46 = vld [vmem:[%s1869_s14 + $0x20] sm:$0xff]  ;;  %v740_v50 = vld [vmem:[%s1869_s14 + $0x28] sm:$0xff] }
 0x139   : > { %1497 = vmatprep.subr.mxu0 %v916_v43  ;;  %1584 = vmatprep.subr.mxu1 %v916_v43  ;;  %v914_v47 = vld [vmem:[%s2108_s5 + $0x60] sm:$0xff]  ;;  %v913_v48 = vld [vmem:[%s2108_s5 + $0x58] sm:$0xff]  ;;  %v912_v51 = vld [vmem:[%s2108_s5 + $0x50] sm:$0xff] }
 0x13a   : > { %814 = vperm.xlu1 %1674, %v744_v36   ;;  %809 = vperm.xlu0 %1673, %v743_v37   ;;  %v749_v52 = vld [vmem:[%s1869_s14 + $0x70] sm:$0xff]  ;;  %v911_v54 = vld [vmem:[%s2108_s5 + $0x48] sm:$0xff]  ;;  %v910_v55 = vld [vmem:[%s2108_s5 + $0x40] sm:$0xff] }
 0x13b   : > { %1498 = vmatpush3.msra.mxu0 %v916_v43  ;;  %1600 = vmatpush3.msra.mxu1 %v916_v43  ;;  %v741_v53 = vld [vmem:[%s1869_s14 + $0x30] sm:$0xff]  ;;  %v750_v56 = vld [vmem:[%s1869_s14 + $0x78] sm:$0xff]  ;;  %v919_v59 = vld [vmem:[%s1874_s15 + $0x8] sm:$0xff] }
 0x13c   : > { %1499 = vmatprep.subr.mxu0 %v915_v44  ;;  %1585 = vmatprep.subr.mxu1 %v915_v44  ;;  %v742_v57 = vld [vmem:[%s1869_s14 + $0x38] sm:$0xff]  ;;  %v918_v60 = vld [vmem:[%s1874_s15] sm:$0xff]  ;;  %v908_v61 = vld [vmem:[%s2108_s5 + $0x30] sm:$0xff] }
 0x13d   : > { %1500 = vmatpush3.msra.mxu0 %v915_v44  ;;  %1601 = vmatpush3.msra.mxu1 %v915_v44  ;;  %v909_v58 = vld [vmem:[%s2108_s5 + $0x38] sm:$0xff]  ;;  %v907_v62 = vld [vmem:[%s2108_s5 + $0x28] sm:$0xff]  ;;  %v920_v0 = vld [vmem:[%s1874_s15 + $0x10] sm:$0xff] }
 0x13e   : > { %819 = vperm.xlu1 %1674, %v745_v38   ;;  %779 = vperm.xlu0 %1673, %v737_v39   ;;  %v921_v63 = vld [vmem:[%s1874_s15 + $0x18] sm:$0xff]  ;;  %v906_v1 = vld [vmem:[%s2108_s5 + $0x20] sm:$0xff]  ;;  %v923_v2 = vld [vmem:[%s1874_s15 + $0x28] sm:$0xff] }
 0x13f   : > { %1501 = vmatprep.subr.mxu0 %v914_v47  ;;  %1586 = vmatprep.subr.mxu1 %v914_v47  ;;  %v922_v3 = vld [vmem:[%s1874_s15 + $0x20] sm:$0xff]  ;;  %v905_v4 = vld [vmem:[%s2108_s5 + $0x18] sm:$0xff]  ;;  %v904_v5 = vld [vmem:[%s2108_s5 + $0x10] sm:$0xff] }
 0x140   : > { %1502 = vmatpush3.msra.mxu0 %v914_v47  ;;  %1602 = vmatpush3.msra.mxu1 %v914_v47  ;;  %v925_v6 = vld [vmem:[%s1874_s15 + $0x38] sm:$0xff]  ;;  %v924_v7 = vld [vmem:[%s1874_s15 + $0x30] sm:$0xff]  ;;  %v903_v8 = vld [vmem:[%s2108_s5 + $0x8] sm:$0xff] }
 0x141   : > { %1503 = vmatprep.subr.mxu0 %v913_v48  ;;  %1587 = vmatprep.subr.mxu1 %v913_v48  ;;  %v927_v9 = vld [vmem:[%s1874_s15 + $0x48] sm:$0xff]  ;;  %v926_v10 = vld [vmem:[%s1874_s15 + $0x40] sm:$0xff]  ;;  %v929_v12 = vld [vmem:[%s1874_s15 + $0x58] sm:$0xff] }
 0x142   : > { %824 = vperm.xlu1 %1674, %v746_v41   ;;  %784 = vperm.xlu0 %1673, %v738_v42   ;;  %v902_v11 = vld [vmem:[%s2108_s5] sm:$0xff]  ;;  %v928_v13 = vld [vmem:[%s1874_s15 + $0x50] sm:$0xff]  ;;  %v931_v14 = vld [vmem:[%s1874_s15 + $0x68] sm:$0xff] }
 0x143   : > { %1504 = vmatpush3.msra.mxu0 %v913_v48  ;;  %1603 = vmatpush3.msra.mxu1 %v913_v48  ;;  %v930_v15 = vld [vmem:[%s1874_s15 + $0x60] sm:$0xff]  ;;  %v933_v16 = vld [vmem:[%s1874_s15 + $0x78] sm:$0xff]  ;;  %v932_v17 = vld [vmem:[%s1874_s15 + $0x70] sm:$0xff] }
 0x144   : > { %1505 = vmatprep.subr.mxu0 %v912_v51  ;;  %1588 = vmatprep.subr.mxu1 %v912_v51  ;;  %v752_v18 = vld [vmem:[#allocation2] sm:$0xff]  ;;  %v751_v19 = vld [vmem:[#allocation2 + $0x30] sm:$0xff]  ;;  %v753_v36 = vld [vmem:[#allocation2 + $0x58] sm:$0xff] }
 0x145   : > { %1506 = vmatpush3.msra.mxu0 %v912_v51  ;;  %1604 = vmatpush3.msra.mxu1 %v912_v51  ;;  %v2000_v20 = vld [vmem:[%s2107_s4] ss:$0 sm:$0xff]  ;;  %v761_v35 = vld [vmem:[#allocation2 + $0x10] sm:$0xff] }
 0x146   : > { %829 = vperm.xlu1 %1674, %v747_v45   ;;  %789 = vperm.xlu0 %1673, %v739_v46   ;;  %v760_v25 = vld [vmem:[#allocation2 + $0x20] sm:$0xff]  ;;  %v762_v45 = vld [vmem:[#allocation2 + $0x38] sm:$0xff] }
 0x147   : > { %1507 = vmatprep.subr.mxu0 %v911_v54  ;;  %1589 = vmatprep.subr.mxu1 %v911_v54  ;;  %v759_v26 = vld [vmem:[#allocation2 + $0x40] sm:$0xff]  ;;  %v754_v46 = vld [vmem:[#allocation2 + $0x18] sm:$0xff] }
 0x148   : > { %1508 = vmatpush3.msra.mxu0 %v911_v54  ;;  %1605 = vmatpush3.msra.mxu1 %v911_v54 }
 0x149   : > { %1509 = vmatprep.subr.mxu0 %v910_v55  ;;  %1590 = vmatprep.subr.mxu1 %v910_v55 }
 0x14a   : > { %834 = vperm.xlu1 %1674, %v748_v49   ;;  %794 = vperm.xlu0 %1673, %v740_v50  }
 0x14b   : > { %1510 = vmatpush3.msra.mxu0 %v910_v55  ;;  %1606 = vmatpush3.msra.mxu1 %v910_v55  ;;  %v763_v55 = vld [vmem:[#allocation2 + $0x60] sm:$0xff] }
 0x14c   : > { %1511 = vmatprep.subr.mxu0 %v909_v58  ;;  %1591 = vmatprep.subr.mxu1 %v909_v58 }
 0x14d   : > { %1512 = vmatpush3.msra.mxu0 %v909_v58  ;;  %1607 = vmatpush3.msra.mxu1 %v909_v58 }
 0x14e   : > { %839 = vperm.xlu1 %1674, %v749_v52   ;;  %799 = vperm.xlu0 %1673, %v741_v53  }
 0x14f   : > { %1513 = vmatprep.subr.mxu0 %v908_v61  ;;  %1592 = vmatprep.subr.mxu1 %v908_v61 }
 0x150   : > { %1514 = vmatpush3.msra.mxu0 %v908_v61  ;;  %1608 = vmatpush3.msra.mxu1 %v908_v61 }
 0x151   : > { %1515 = vmatprep.subr.mxu0 %v907_v62  ;;  %1593 = vmatprep.subr.mxu1 %v907_v62 }
 0x152   : > { %844 = vperm.xlu1 %1674, %v750_v56   ;;  %804 = vperm.xlu0 %1673, %v742_v57   ;;  %v755_v56 = vld [vmem:[#allocation2 + $0x50] sm:$0xff] }
 0x153   : > { %1516 = vmatpush3.msra.mxu0 %v907_v62  ;;  %1609 = vmatpush3.msra.mxu1 %v907_v62 }
 0x154   : > { %1517 = vmatprep.subr.mxu0 %v906_v1  ;;  %1594 = vmatprep.subr.mxu1 %v906_v1 }
 0x155   : > { %1518 = vmatpush3.msra.mxu0 %v906_v1  ;;  %1610 = vmatpush3.msra.mxu1 %v906_v1  ;;  %v764_v1 = vld [vmem:[#allocation2 + $0x70] sm:$0xff] }
 0x156   : > { %942 = vperm.xlu1 %1674, %v919_v59   ;;  %937 = vperm.xlu0 %1673, %v918_v60  }
 0x157   : > { %1519 = vmatprep.subr.mxu0 %v905_v4  ;;  %1595 = vmatprep.subr.mxu1 %v905_v4 }
 0x158   : > { %1520 = vmatpush3.msra.mxu0 %v905_v4  ;;  %1611 = vmatpush3.msra.mxu1 %v905_v4 }
 0x159   : > { %1521 = vmatprep.subr.mxu0 %v904_v5  ;;  %1596 = vmatprep.subr.mxu1 %v904_v5 }
 0x15a   : > { %952 = vperm.xlu1 %1674, %v921_v63   ;;  %947 = vperm.xlu0 %1673, %v920_v0  }
 0x15b   : > { %1522 = vmatpush3.msra.mxu0 %v904_v5  ;;  %1612 = vmatpush3.msra.mxu1 %v904_v5 }
 0x15c   : > { %1523 = vmatprep.subr.mxu0 %v903_v8  ;;  %1597 = vmatprep.subr.mxu1 %v903_v8 }
 0x15d   : > { %1524 = vmatpush3.msra.mxu0 %v903_v8  ;;  %1613 = vmatpush3.msra.mxu1 %v903_v8 }
 0x15e   : > { %962 = vperm.xlu1 %1674, %v923_v2   ;;  %957 = vperm.xlu0 %1673, %v922_v3   ;;  %v756_v2 = vld [vmem:[#allocation2 + $0x68] sm:$0xff] }
 0x15f   : > { %1525 = vmatprep.subr.mxu0 %v902_v11  ;;  %1598 = vmatprep.subr.mxu1 %v902_v11 }
 0x160   : > { %1526 = vmatpush3.msra.mxu0 %v902_v11  ;;  %1614 = vmatpush3.msra.mxu1 %v902_v11  ;;  %v765_v11 = vld [vmem:[#allocation2 + $0x78] sm:$0xff] }
 0x162   : > { %972 = vperm.xlu1 %1674, %v925_v6   ;;  %967 = vperm.xlu0 %1673, %v924_v7  }
 0x166   : > { %982 = vperm.xlu1 %1674, %v927_v9   ;;  %977 = vperm.xlu0 %1673, %v926_v10  }
 0x16a   : > { %992 = vperm.xlu1 %1674, %v929_v12   ;;  %987 = vperm.xlu0 %1673, %v928_v13   ;;  %v757_v12 = vld [vmem:[#allocation2 + $0x8] sm:$0xff] }
 0x16e   : > { %1002 = vperm.xlu1 %1674, %v931_v14   ;;  %997 = vperm.xlu0 %1673, %v930_v15  }
 0x172   : > { %1012 = vperm.xlu1 %1674, %v933_v16   ;;  %1007 = vperm.xlu0 %1673, %v932_v17  }
 0x1b1   : > { %v775_v21 = vpop.permute.xlu1 %774  ;;  %v770_v22 = vpop.permute.xlu0 %769 }
 0x1b2   : > { %v848_v23 = vmul.f32 %v775_v21, %v752_v18  ;;  %v847_v24 = vmul.f32 %v770_v22, %v751_v19  ;;  %v766_v22 = vld [vmem:[#allocation2 + $0x28] sm:$0xff] }
 0x1b4   : > { %v871_v27 = vadd.f32 %v2000_v20, %v848_v23  ;;  %v870_v28 = vadd.f32 %v2000_v20, %v847_v24  ;;  %v758_v23 = vld [vmem:[#allocation2 + $0x48] sm:$0xff] }
 0x1b5   : > { %v815_v29 = vpop.permute.xlu1 %814  ;;  %v810_v30 = vpop.permute.xlu0 %809 }
 0x1b6   : > { %v887_v31 = vmax.f32 %v871_v27, 0.0  ;;  %v856_v32 = vmul.f32 %v815_v29, %v760_v25  ;;  %v855_v33 = vmul.f32 %v810_v30, %v759_v26  ;;  %v886_v34 = vmax.f32 %v870_v28, 0.0 }
 0x1b8   : > { %v879_v37 = vadd.f32 %v2000_v20, %v856_v32  ;;  %1527 = vmatprep.mubr.f32.mxu0 %v886_v34  ;;  %v878_v38 = vadd.f32 %v2000_v20, %v855_v33 }
 0x1b9   : > { %v820_v39 = vpop.permute.xlu1 %819  ;;  %1528 = vmatmul.mubr.f32.vlgmr.msra.gmra.mxu0 %v887_v31  ;;  %v780_v40 = vpop.permute.xlu0 %779 }
 0x1ba   : > { %v895_v41 = vmax.f32 %v879_v37, 0.0  ;;  %v857_v42 = vmul.f32 %v820_v39, %v761_v35  ;;  %v849_v43 = vmul.f32 %v780_v40, %v753_v36  ;;  %v894_v44 = vmax.f32 %v878_v38, 0.0 }
 0x1bc   : > { %v880_v47 = vadd.f32 %v2000_v20, %v857_v42  ;;  %v872_v48 = vadd.f32 %v2000_v20, %v849_v43  ;;  %1539 = vmatprep.mubr.f32.mxu1 %v894_v44  ;;  %v2023_v43 = vld [vmem:[%s2109_s6] ss:$0 sm:$0xff] }
 0x1bd   : > { %v825_v49 = vpop.permute.xlu1 %824  ;;  %1540 = vmatmul.mubr.f32.vlgmr.msra.gmra.mxu1 %v895_v41  ;;  %v785_v50 = vpop.permute.xlu0 %784 }
 0x1be   : > { %v896_v51 = vmax.f32 %v880_v47, 0.0  ;;  %v888_v52 = vmax.f32 %v872_v48, 0.0  ;;  %v858_v53 = vmul.f32 %v825_v49, %v762_v45  ;;  %v850_v54 = vmul.f32 %v785_v50, %v754_v46  ;;  %v2031_v47 = vld [vmem:[%s2110_s7] ss:$0 sm:$0xff] }
 0x1c0   : > { %v881_v57 = vadd.f32 %v2000_v20, %v858_v53  ;;  %v873_v58 = vadd.f32 %v2000_v20, %v850_v54  ;;  %1530 = vmatprep.mubr.f32.mxu0 %v888_v52  ;;  %1542 = vmatprep.mubr.f32.mxu1 %v896_v51 }
 0x1c1   : > { %v830_v59 = vpop.permute.xlu1 %829  ;;  %v790_v60 = vpop.permute.xlu0 %789 }
 0x1c2   : > { %v897_v61 = vmax.f32 %v881_v57, 0.0  ;;  %v889_v62 = vmax.f32 %v873_v58, 0.0  ;;  %v859_v63 = vmul.f32 %v830_v59, %v763_v55  ;;  %v851_v0 = vmul.f32 %v790_v60, %v755_v56 }
 0x1c4   : > { %v882_v3 = vadd.f32 %v2000_v20, %v859_v63  ;;  %v874_v4 = vadd.f32 %v2000_v20, %v851_v0  ;;  %1531 = vmatmul.mubr.f32.gmra.mxu0 %v889_v62  ;;  %1543 = vmatmul.mubr.f32.gmra.mxu1 %v897_v61 }
 0x1c5   : > { %v835_v5 = vpop.permute.xlu1 %834  ;;  %v795_v6 = vpop.permute.xlu0 %794 }
 0x1c6   : > { %v898_v7 = vmax.f32 %v882_v3, 0.0  ;;  %v890_v8 = vmax.f32 %v874_v4, 0.0  ;;  %v860_v9 = vmul.f32 %v835_v5, %v764_v1  ;;  %v852_v10 = vmul.f32 %v795_v6, %v756_v2 }
 0x1c8   : > { %v883_v13 = vadd.f32 %v2000_v20, %v860_v9  ;;  %v875_v14 = vadd.f32 %v2000_v20, %v852_v10  ;;  %1533 = vmatprep.mubr.f32.mxu0 %v890_v8  ;;  %1545 = vmatprep.mubr.f32.mxu1 %v898_v7 }
 0x1c9   : > { %v840_v15 = vpop.permute.xlu1 %839  ;;  %v800_v16 = vpop.permute.xlu0 %799 }
 0x1ca   : > { %v899_v17 = vmax.f32 %v883_v13, 0.0  ;;  %v891_v18 = vmax.f32 %v875_v14, 0.0  ;;  %v861_v19 = vmul.f32 %v840_v15, %v765_v11  ;;  %v853_v21 = vmul.f32 %v800_v16, %v757_v12 }
 0x1cc   : > { %v884_v24 = vadd.f32 %v2000_v20, %v861_v19  ;;  %v876_v25 = vadd.f32 %v2000_v20, %v853_v21  ;;  %1534 = vmatmul.mubr.f32.gmra.mxu0 %v891_v18  ;;  %1546 = vmatmul.mubr.f32.gmra.mxu1 %v899_v17 }
 0x1cd   : > { %v845_v26 = vpop.permute.xlu1 %844  ;;  %v805_v27 = vpop.permute.xlu0 %804 }
 0x1ce   : > { %v900_v28 = vmax.f32 %v884_v24, 0.0  ;;  %v892_v29 = vmax.f32 %v876_v25, 0.0  ;;  %v862_v30 = vmul.f32 %v845_v26, %v766_v22  ;;  %v854_v31 = vmul.f32 %v805_v27, %v758_v23 }
 0x1d0   : > { %v885_v32 = vadd.f32 %v2000_v20, %v862_v30  ;;  %v877_v33 = vadd.f32 %v2000_v20, %v854_v31  ;;  %1536 = vmatprep.mubr.f32.mxu0 %v892_v29  ;;  %1548 = vmatprep.mubr.f32.mxu1 %v900_v28 }
 0x1d1   : > { %v943_v36 = vpop.permute.xlu1 %942  ;;  %v938_v37 = vpop.permute.xlu0 %937 }
 0x1d2   : > { %v901_v34 = vmax.f32 %v885_v32, 0.0  ;;  %v893_v35 = vmax.f32 %v877_v33, 0.0  ;;  %v1022_v44 = vmul.f32 %v2023_v43, %v943_v36  ;;  %v1021_v48 = vmul.f32 %v2023_v43, %v938_v37 }
 0x1d4   : > { %1537 = vmatmul.mubr.f32.gmra.mxu0 %v893_v35  ;;  %1549 = vmatmul.mubr.f32.gmra.mxu1 %v901_v34 }
 0x1d5   : > { %v953_v38 = vpop.permute.xlu1 %952  ;;  %v948_v39 = vpop.permute.xlu0 %947 }
 0x1d6   : > { %v1024_v4 = vmul.f32 %v2023_v43, %v953_v38  ;;  %v1023_v9 = vmul.f32 %v2023_v43, %v948_v39 }
 0x1d9   : > { %v963_v40 = vpop.permute.xlu1 %962  ;;  %v958_v41 = vpop.permute.xlu0 %957 }
 0x1da   : > { %v1026_v26 = vmul.f32 %v2023_v43, %v963_v40  ;;  %v1025_v32 = vmul.f32 %v2023_v43, %v958_v41 }
 0x1dd   : > { %v2018_v42 = vpop.permute.xlu1 %972  ;;  %v2025_v20 = vpop.permute.xlu0 %967 }
 0x1e1   : > { %v983_v45 = vpop.permute.xlu1 %982  ;;  %v978_v50 = vpop.permute.xlu0 %977 }
 0x1e2   : > { %v1030_v52 = vmul.f32 %v2023_v43, %v983_v45  ;;  %v1029_v56 = vmul.f32 %v2023_v43, %v978_v50 }
 0x1e5   : > { %v993_v61 = vpop.permute.xlu1 %992  ;;  %v988_v1 = vpop.permute.xlu0 %987 }
 0x1e6   : > { %v1032_v5 = vmul.f32 %v2023_v43, %v993_v61  ;;  %v1031_v10 = vmul.f32 %v2023_v43, %v988_v1 }
 0x1e9   : > { %v1003_v19 = vpop.permute.xlu1 %1002  ;;  %v998_v25 = vpop.permute.xlu0 %997 }
 0x1ea   : > { %v1034_v27 = vmul.f32 %v2023_v43, %v1003_v19  ;;  %v1033_v33 = vmul.f32 %v2023_v43, %v998_v25 }
 0x1ed   : > { %v1013_v45 = vpop.permute.xlu1 %1012  ;;  %v1008_v50 = vpop.permute.xlu0 %1007 }
 0x279   : > { %v1529_v46 = vpop.f32.mrf.mxu0 }
 0x27a   : > { %v1109_v49 = vadd.f32 %v1529_v46, %v1022_v44 }
 0x27b   : > { %v1103_v51 = vpop.f32.mrf.mxu0 }
 0x27c   : > { %v1190_v53 = vadd.f32 %v2031_v47, %v1109_v49  ;;  %v1104_v54 = vadd.f32 %v1103_v51, %v1021_v48  ;;  %v1028_v51 = vmul.f32 %v2023_v43, %v2018_v42 }
 0x27d   : > { %v1541_v55 = vpop.f32.mrf.mxu1 }
 0x27e   : > { %v1206_v57 = vmax.f32 %v1190_v53, 0.0  ;;  %v1189_v58 = vadd.f32 %v2031_v47, %v1104_v54  ;;  %v1149_v59 = vadd.f32 %v1541_v55, %v1030_v52  ;;  %v1036_v52 = vmul.f32 %v2023_v43, %v1013_v45 }
 0x27f   : > { %v1143_v60 = vpop.f32.mrf.mxu1 }
 0x280   : > { %1222 = vst [vmem:[%s1879_s16 + $0x8] sm:$0xff] %v1206_v57  ;;  %v1205_v62 = vmax.f32 %v1189_v58, 0.0  ;;  %v1198_v63 = vadd.f32 %v2031_v47, %v1149_v59  ;;  %v1144_v0 = vadd.f32 %v1143_v60, %v1029_v56  ;;  %v1027_v57 = vmul.f32 %v2023_v43, %v2025_v20 }
 0x281   : > { %v1035_v58 = vmul.f32 %v2023_v43, %v1008_v50 }
 0x282   : > { %1221 = vst [vmem:[%s1879_s16] sm:$0xff] %v1205_v62  ;;  %v1214_v2 = vmax.f32 %v1198_v63, 0.0  ;;  %v1197_v3 = vadd.f32 %v2031_v47, %v1144_v0 }
 0x284   : > { %1230 = vst [vmem:[%s1879_s16 + $0x48] sm:$0xff] %v1214_v2  ;;  %v1213_v6 = vmax.f32 %v1197_v3, 0.0  ;;  %v1532_v7 = vpop.f32.mrf.mxu0  ;;  %v1544_v8 = vpop.f32.mrf.mxu1 }
 0x285   : > { %v1119_v11 = vadd.f32 %v1532_v7, %v1024_v4  ;;  %v1159_v12 = vadd.f32 %v1544_v8, %v1032_v5 }
 0x286   : > { %1229 = vst [vmem:[%s1879_s16 + $0x40] sm:$0xff] %v1213_v6  ;;  %v1113_v13 = vpop.f32.mrf.mxu0  ;;  %v1153_v14 = vpop.f32.mrf.mxu1 }
 0x287   : > { %v1192_v15 = vadd.f32 %v2031_v47, %v1119_v11  ;;  %v1200_v16 = vadd.f32 %v2031_v47, %v1159_v12  ;;  %v1114_v17 = vadd.f32 %v1113_v13, %v1023_v9  ;;  %v1154_v18 = vadd.f32 %v1153_v14, %v1031_v10 }
 0x289   : > { %v1208_v21 = vmax.f32 %v1192_v15, 0.0  ;;  %v1216_v22 = vmax.f32 %v1200_v16, 0.0  ;;  %v1191_v23 = vadd.f32 %v2031_v47, %v1114_v17  ;;  %v1199_v24 = vadd.f32 %v2031_v47, %v1154_v18 }
 0x28b   : > { %1224 = vst [vmem:[%s1879_s16 + $0x18] sm:$0xff] %v1208_v21  ;;  %1232 = vst [vmem:[%s1879_s16 + $0x58] sm:$0xff] %v1216_v22  ;;  %v1207_v28 = vmax.f32 %v1191_v23, 0.0  ;;  %v1215_v29 = vmax.f32 %v1199_v24, 0.0 }
 0x28c   : > { %v1535_v30 = vpop.f32.mrf.mxu0  ;;  %v1547_v31 = vpop.f32.mrf.mxu1 }
 0x28d   : > { %1223 = vst [vmem:[%s1879_s16 + $0x10] sm:$0xff] %v1207_v28  ;;  %1231 = vst [vmem:[%s1879_s16 + $0x50] sm:$0xff] %v1215_v29  ;;  %v1129_v34 = vadd.f32 %v1535_v30, %v1026_v26  ;;  %v1169_v35 = vadd.f32 %v1547_v31, %v1034_v27 }
 0x28e   : > { %v1123_v36 = vpop.f32.mrf.mxu0  ;;  %v1163_v37 = vpop.f32.mrf.mxu1 }
 0x28f   : > { %v1194_v38 = vadd.f32 %v2031_v47, %v1129_v34  ;;  %v1202_v39 = vadd.f32 %v2031_v47, %v1169_v35  ;;  %v1124_v40 = vadd.f32 %v1123_v36, %v1025_v32  ;;  %v1164_v44 = vadd.f32 %v1163_v37, %v1033_v33 }
 0x291   : > { %v1210_v46 = vmax.f32 %v1194_v38, 0.0  ;;  %v1218_v41 = vmax.f32 %v1202_v39, 0.0  ;;  %v1193_v48 = vadd.f32 %v2031_v47, %v1124_v40  ;;  %v1201_v49 = vadd.f32 %v2031_v47, %v1164_v44 }
 0x293   : > { %1226 = vst [vmem:[%s1879_s16 + $0x28] sm:$0xff] %v1210_v46  ;;  %1234 = vst [vmem:[%s1879_s16 + $0x68] sm:$0xff] %v1218_v41  ;;  %v1209_v53 = vmax.f32 %v1193_v48, 0.0  ;;  %v1217_v54 = vmax.f32 %v1201_v49, 0.0 }
 0x294   : > { %v1538_v55 = vpop.f32.mrf.mxu0  ;;  %v1550_v56 = vpop.f32.mrf.mxu1 }
 0x295   : > { %1225 = vst [vmem:[%s1879_s16 + $0x20] sm:$0xff] %v1209_v53  ;;  %1233 = vst [vmem:[%s1879_s16 + $0x60] sm:$0xff] %v1217_v54  ;;  %v1139_v59 = vadd.f32 %v1538_v55, %v1028_v51  ;;  %v1179_v42 = vadd.f32 %v1550_v56, %v1036_v52 }
 0x296   : > { %v1133_v60 = vpop.f32.mrf.mxu0  ;;  %v1173_v61 = vpop.f32.mrf.mxu1 }
 0x297   : > { %v1196_v62 = vadd.f32 %v2031_v47, %v1139_v59  ;;  %v1204_v63 = vadd.f32 %v2031_v47, %v1179_v42  ;;  %v1134_v0 = vadd.f32 %v1133_v60, %v1027_v57  ;;  %v1174_v1 = vadd.f32 %v1173_v61, %v1035_v58 }
 0x299   : > { %v1212_v2 = vmax.f32 %v1196_v62, 0.0  ;;  %v1220_v20 = vmax.f32 %v1204_v63, 0.0  ;;  %v1195_v3 = vadd.f32 %v2031_v47, %v1134_v0  ;;  %v1203_v43 = vadd.f32 %v2031_v47, %v1174_v1 }
 0x29b   : > { %1228 = vst [vmem:[%s1879_s16 + $0x38] sm:$0xff] %v1212_v2  ;;  %1236 = vst [vmem:[%s1879_s16 + $0x78] sm:$0xff] %v1220_v20  ;;  %v1211_v4 = vmax.f32 %v1195_v3, 0.0  ;;  %v1219_v5 = vmax.f32 %v1203_v43, 0.0 }
 0x29d   : > { %1227 = vst [vmem:[%s1879_s16 + $0x30] sm:$0xff] %v1211_v4  ;;  %1235 = vst [vmem:[%s1879_s16 + $0x70] sm:$0xff] %v1219_v5 }
 0x29e PF: > { %s18_s11 = sadd.s32 1, %s1729_s11   ;;  %s2116_s23 = sld [smem:[#allocation4_spill]] }
 0x29f   : > { %p15_p0 = scmp.ge.s32.totalorder %s18_s11, 6   ;;  %s2117_s27 = smov %s1709_s28 }
 0x2a0   : > { %s2118_s28 = smov %s1829_s18  ;;  %s2119_s29 = smov %s1721_s9 }
 0x2a1   : > { %s2120_s30 = smov %s1725_s10  ;;  %s2121_s9 = smov %s2124_s12 }
 0x2a2   :  { %17 = sbr.rel (!%p15_p0) target bundleno = 6 (0x6), region = 142 }
 0x2a4   : > { %s2122_s10 = smov %s2116_s23 }

</bundles_post_ra>
